<compile_context>
chip_gen: v5e
topology: v5e:2x2
jax: 0.10.0
libtpu: 0.0.40
codegen_flags: <defaults>
</compile_context>

<pallas_src>
import functools
import jax
import jax.numpy as jnp
from jax.experimental import pallas as pl
from jax.experimental.pallas import tpu as pltpu

# ---------------- problem sizes (small, consistent with the module) -------------
N_NODES = 16        # total nodes across graphs
N_EDGES = 32        # total edges
F_NODE = 4          # num_node_features
F_EDGE = 4          # num_edge_features
N_GRAPHS = 2        # graphs in the batch
H1 = 32             # conv1 out channels
H2 = 16             # conv2 out channels
FC = 32             # fc_1 out


# ------------- in-kernel 0/1 expand / reduce constants for NNConv messages ------
def _expand_mat(f_in, f_out):
    # R[f, f*f_out + o] = 1  ->  (x_src @ R)[e, f*f_out + o] = x_src[e, f]
    r = jax.lax.broadcasted_iota(jnp.int32, (f_in, f_in * f_out), 0)
    c = jax.lax.broadcasted_iota(jnp.int32, (f_in, f_in * f_out), 1)
    return ((c >= r * f_out) & (c < (r + 1) * f_out)).astype(jnp.float32)


def _reduce_mat(f_in, f_out):
    # S[f*f_out + o, o] = 1  ->  (m @ S)[e, o] = sum_f m[e, f*f_out + o]
    assert f_out & (f_out - 1) == 0, "f_out must be a power of two (32 / 16 here)"
    r = jax.lax.broadcasted_iota(jnp.int32, (f_in * f_out, f_out), 0)
    c = jax.lax.broadcasted_iota(jnp.int32, (f_in * f_out, f_out), 1)
    return ((r & (f_out - 1)) == c).astype(jnp.float32)


# -------------------------------- the kernel ------------------------------------
def examplenet_kernel(feat_ref, gsrc_ref, sdst_ref, pool_ref,
                      ps_ref, pm_ref, pb_ref, out_ref):
    relu = lambda v: jnp.maximum(v, 0.0)
    dot = functools.partial(jnp.dot, preferred_element_type=jnp.float32)

    feat = feat_ref[...]                         # [N+E, 4]
    x = feat[0:N_NODES, :]                       # [N, F_NODE]
    ea = feat[N_NODES:N_NODES + N_EDGES, :]      # [E, F_EDGE]
    gsrc = gsrc_ref[...]                         # [E, N]
    sdst = sdst_ref[...]                         # [N, E]
    pool = pool_ref[...]                         # [G, N]

    # Packed parameters (static, 8-row-aligned offsets; see _pack_params).
    ps = ps_ref[...]                             # [128, 32]
    pm = pm_ref[...]                             # [40, 128]
    pb = pb_ref[...]                             # [40, 512]

    wa1 = ps[0:4, :];     ba1 = ps[8:9, :]       # conv1 edge-net L1
    wr1 = ps[16:20, :];   b1 = ps[24:25, :]      # conv1 root + bias
    wb1 = ps[32:36, :];   bb1 = ps[40:41, :]     # conv2 edge-net L1
    wr2 = ps[48:80, 0:H2]; b2 = ps[80:81, 0:H2]  # conv2 root + bias
    wfc = ps[88:104, :];  bfc = ps[104:105, :]   # fc_1
    wo_row = ps[112:113, :]; bo = ps[120:121, 0:1]  # out (wo stored transposed)

    wa2 = pm[0:32, :];    ba2 = pm[32:33, :]     # conv1 edge-net L2
    wb2 = pb[0:32, :];    bb2 = pb[32:33, :]     # conv2 edge-net L2

    # Constant 0/1 expand/reduce matrices (built once per call, MXU-friendly).
    R1 = _expand_mat(F_NODE, H1)                 # [4, 128]
    S1 = _reduce_mat(F_NODE, H1)                 # [128, 32]
    R2 = _expand_mat(H1, H2)                     # [32, 512]
    S2 = _reduce_mat(H1, H2)                     # [512, 16]

    # ---------------- conv1 (NNConv: F_NODE -> H1) ----------------
    h1 = relu(dot(ea, wa1) + ba1)                        # [E, 32]
    w_flat1 = dot(h1, wa2) + ba2                         # [E, F_NODE*H1]
    x_src = dot(gsrc, x)                                 # [E, F_NODE]  gather x_j
    msg1 = dot(dot(x_src, R1) * w_flat1, S1)             # [E, H1]
    agg1 = dot(sdst, msg1)                               # [N, H1]      scatter-add
    x1 = relu(agg1 + dot(x, wr1) + b1)                   # [N, H1]

    # ---------------- conv2 (NNConv: H1 -> H2) ----------------
    h2 = relu(dot(ea, wb1) + bb1)                        # [E, 32]
    w_flat2 = dot(h2, wb2) + bb2                         # [E, H1*H2]
    x1_src = dot(gsrc, x1)                               # [E, H1]
    msg2 = dot(dot(x1_src, R2) * w_flat2, S2)            # [E, H2]
    agg2 = dot(sdst, msg2)                               # [N, H2]
    x2 = relu(agg2 + dot(x1, wr2) + b2)                  # [N, H2]

    # ---------------- global_add_pool + head ----------------
    pooled = dot(pool, x2)                               # [G, H2]
    h3 = relu(dot(pooled, wfc) + bfc)                    # [G, FC]
    out_ref[...] = jnp.sum(h3 * wo_row, axis=1, keepdims=True) + bo   # [G, 1]


# --------------------------- host-side parameter packing ------------------------
def _pack_params(params):
    """Pack the 16 parameter tensors into 3 slabs (8-row-aligned static offsets)."""
    (wa1, ba1, wa2, ba2, wr1, b1,
     wb1, bb1, wb2, bb2, wr2, b2,
     wfc, bfc, wo, bo) = params

    def block(arr, rows, cols):
        out = jnp.zeros((rows, cols), jnp.float32)
        return out.at[:arr.shape[0], :arr.shape[1]].set(arr)

    p_small = jnp.concatenate([
        block(wa1, 8, 32),  block(ba1, 8, 32),     # rows   0,   8
        block(wr1, 8, 32),  block(b1, 8, 32),      # rows  16,  24
        block(wb1, 8, 32),  block(bb1, 8, 32),     # rows  32,  40
        block(wr2, 32, 32), block(b2, 8, 32),      # rows  48,  80
        block(wfc, 16, 32), block(bfc, 8, 32),     # rows  88, 104
        block(wo.T, 8, 32), block(bo, 8, 32),      # rows 112, 120
    ], axis=0)                                     # [128, 32]
    p_mid = jnp.concatenate([wa2, block(ba2, 8, 128)], axis=0)   # [40, 128]
    p_big = jnp.concatenate([wb2, block(bb2, 8, 512)], axis=0)   # [40, 512]
    return p_small, p_mid, p_big


@jax.jit
def examplenet_forward(x, edge_attr, gather_src, scatter_dst, pool_mat, params):
    feat = jnp.concatenate([x, edge_attr], axis=0)          # [N+E, F]
    p_small, p_mid, p_big = _pack_params(params)
    args = (feat, gather_src, scatter_dst, pool_mat, p_small, p_mid, p_big)
    vmem = pl.BlockSpec(memory_space=pltpu.MemorySpace.VMEM)
    return pl.pallas_call(
        examplenet_kernel,
        out_shape=jax.ShapeDtypeStruct((N_GRAPHS, 1), jnp.float32),
        in_specs=[vmem] * len(args),
        out_specs=vmem,
    )(*args)


# ---------------------- pure-JAX reference (for verification) -------------------
def reference_forward(x, edge_attr, src, dst, batch, params):
    (wa1, ba1, wa2, ba2, wr1, b1,
     wb1, bb1, wb2, bb2, wr2, b2,
     wfc, bfc, wo, bo) = params
    relu = lambda v: jnp.maximum(v, 0.0)

    def nnconv(xn, win, bin_, wout, bout, wroot, bias, f_in, f_out):
        h = relu(edge_attr @ win + bin_)
        w_flat = h @ wout + bout
        w_e = w_flat.reshape(-1, f_in, f_out)
        msg = jnp.einsum('ef,efo->eo', xn[src], w_e)
        agg = jax.ops.segment_sum(msg, dst, num_segments=xn.shape[0])
        return agg + xn @ wroot + bias

    x1 = relu(nnconv(x, wa1, ba1, wa2, ba2, wr1, b1, F_NODE, H1))
    x2 = relu(nnconv(x1, wb1, bb1, wb2, bb2, wr2, b2, H1, H2))
    pooled = jax.ops.segment_sum(x2, batch, num_segments=N_GRAPHS)
    h3 = relu(pooled @ wfc + bfc)
    return h3 @ wo + bo


def init_params(key):
    def lin(key, fan_in, fan_out):
        kw, kb = jax.random.split(key)
        w = jax.random.normal(kw, (fan_in, fan_out), jnp.float32) * (1.0 / jnp.sqrt(fan_in))
        b = jax.random.normal(kb, (1, fan_out), jnp.float32) * 0.05
        return w, b

    ks = jax.random.split(key, 8)
    wa1, ba1 = lin(ks[0], F_EDGE, 32)            # conv1 edge-net layer 1
    wa2, ba2 = lin(ks[1], 32, F_NODE * H1)       # conv1 edge-net layer 2
    wr1, b1 = lin(ks[2], F_NODE, H1)             # conv1 root weight + bias
    wb1, bb1 = lin(ks[3], F_EDGE, 32)            # conv2 edge-net layer 1
    wb2, bb2 = lin(ks[4], 32, H1 * H2)           # conv2 edge-net layer 2
    wr2, b2 = lin(ks[5], H1, H2)                 # conv2 root weight + bias
    wfc, bfc = lin(ks[6], H2, FC)                # fc_1
    wo, bo = lin(ks[7], FC, 1)                   # out
    return (wa1, ba1, wa2, ba2, wr1, b1,
            wb1, bb1, wb2, bb2, wr2, b2,
            wfc, bfc, wo, bo)


if __name__ == "__main__":
    key = jax.random.PRNGKey(0)
    k_x, k_ea, k_src, k_dst, k_params = jax.random.split(key, 5)

    # node / edge features
    x = jax.random.normal(k_x, (N_NODES, F_NODE), jnp.float32)
    edge_attr = jax.random.normal(k_ea, (N_EDGES, F_EDGE), jnp.float32)

    # batch assignment: first half of the nodes -> graph 0, second half -> graph 1
    half = N_NODES // 2
    batch = jnp.concatenate([jnp.zeros((half,), jnp.int32),
                             jnp.ones((N_NODES - half,), jnp.int32)])

    # edges kept within their own graph
    eh = N_EDGES // 2
    src = jnp.concatenate([
        jax.random.randint(k_src, (eh,), 0, half),
        jax.random.randint(jax.random.fold_in(k_src, 1), (N_EDGES - eh,), half, N_NODES),
    ]).astype(jnp.int32)
    dst = jnp.concatenate([
        jax.random.randint(k_dst, (eh,), 0, half),
        jax.random.randint(jax.random.fold_in(k_dst, 1), (N_EDGES - eh,), half, N_NODES),
    ]).astype(jnp.int32)

    # dense 0/1 matrices turning gather / scatter-add / pooling into matmuls
    gather_src = jax.nn.one_hot(src, N_NODES, dtype=jnp.float32)          # [E, N]
    scatter_dst = jax.nn.one_hot(dst, N_NODES, dtype=jnp.float32).T       # [N, E]
    pool_mat = jax.nn.one_hot(batch, N_GRAPHS, dtype=jnp.float32).T       # [G, N]

    params = init_params(k_params)

    out = examplenet_forward(x, edge_attr, gather_src, scatter_dst, pool_mat, params)
    out = jax.block_until_ready(out)

    ref = reference_forward(x, edge_attr, src, dst, batch, params)
    assert out.shape == (N_GRAPHS, 1), out.shape
    assert jnp.allclose(out, ref, rtol=2e-3, atol=2e-3), (out, ref)

    print("KERNEL_OK")
</pallas_src>

<mosaic_0001>
module attributes {stable_mosaic.version = 11 : i64} {
  func.func @examplenet_kernel(%arg0: memref<48x4xf32, #tpu.memory_space<vmem>>, %arg1: memref<32x16xf32, #tpu.memory_space<vmem>>, %arg2: memref<16x32xf32, #tpu.memory_space<vmem>>, %arg3: memref<2x16xf32, #tpu.memory_space<vmem>>, %arg4: memref<128x32xf32, #tpu.memory_space<vmem>>, %arg5: memref<40x128xf32, #tpu.memory_space<vmem>>, %arg6: memref<40x512xf32, #tpu.memory_space<vmem>>, %arg7: memref<2x1xf32, #tpu.memory_space<vmem>>) attributes {dimension_semantics = [], scalar_prefetch = 0 : i64, scratch_operands = 0 : i64, tpu.core_type = #tpu.core_type<tc>} {
    %c0 = arith.constant 0 : index
    %c0_0 = arith.constant 0 : index
    %0 = vector.load %arg0[%c0, %c0_0] : memref<48x4xf32, #tpu.memory_space<vmem>>, vector<48x4xf32>
    %1 = vector.extract_strided_slice %0 {offsets = [0, 0], sizes = [16, 4], strides = [1, 1]} : vector<48x4xf32> to vector<16x4xf32>
    %2 = vector.extract_strided_slice %0 {offsets = [16, 0], sizes = [32, 4], strides = [1, 1]} : vector<48x4xf32> to vector<32x4xf32>
    %c0_1 = arith.constant 0 : index
    %c0_2 = arith.constant 0 : index
    %3 = vector.load %arg1[%c0_1, %c0_2] : memref<32x16xf32, #tpu.memory_space<vmem>>, vector<32x16xf32>
    %c0_3 = arith.constant 0 : index
    %c0_4 = arith.constant 0 : index
    %4 = vector.load %arg2[%c0_3, %c0_4] : memref<16x32xf32, #tpu.memory_space<vmem>>, vector<16x32xf32>
    %c0_5 = arith.constant 0 : index
    %c0_6 = arith.constant 0 : index
    %5 = vector.load %arg3[%c0_5, %c0_6] : memref<2x16xf32, #tpu.memory_space<vmem>>, vector<2x16xf32>
    %c0_7 = arith.constant 0 : index
    %c0_8 = arith.constant 0 : index
    %6 = vector.load %arg4[%c0_7, %c0_8] : memref<128x32xf32, #tpu.memory_space<vmem>>, vector<128x32xf32>
    %c0_9 = arith.constant 0 : index
    %c0_10 = arith.constant 0 : index
    %7 = vector.load %arg5[%c0_9, %c0_10] : memref<40x128xf32, #tpu.memory_space<vmem>>, vector<40x128xf32>
    %c0_11 = arith.constant 0 : index
    %c0_12 = arith.constant 0 : index
    %8 = vector.load %arg6[%c0_11, %c0_12] : memref<40x512xf32, #tpu.memory_space<vmem>>, vector<40x512xf32>
    %9 = vector.extract_strided_slice %6 {offsets = [0, 0], sizes = [4, 32], strides = [1, 1]} : vector<128x32xf32> to vector<4x32xf32>
    %10 = vector.extract_strided_slice %6 {offsets = [8, 0], sizes = [1, 32], strides = [1, 1]} : vector<128x32xf32> to vector<1x32xf32>
    %11 = vector.extract_strided_slice %6 {offsets = [16, 0], sizes = [4, 32], strides = [1, 1]} : vector<128x32xf32> to vector<4x32xf32>
    %12 = vector.extract_strided_slice %6 {offsets = [24, 0], sizes = [1, 32], strides = [1, 1]} : vector<128x32xf32> to vector<1x32xf32>
    %13 = vector.extract_strided_slice %6 {offsets = [32, 0], sizes = [4, 32], strides = [1, 1]} : vector<128x32xf32> to vector<4x32xf32>
    %14 = vector.extract_strided_slice %6 {offsets = [40, 0], sizes = [1, 32], strides = [1, 1]} : vector<128x32xf32> to vector<1x32xf32>
    %15 = vector.extract_strided_slice %6 {offsets = [48, 0], sizes = [32, 16], strides = [1, 1]} : vector<128x32xf32> to vector<32x16xf32>
    %16 = vector.extract_strided_slice %6 {offsets = [80, 0], sizes = [1, 16], strides = [1, 1]} : vector<128x32xf32> to vector<1x16xf32>
    %17 = vector.extract_strided_slice %6 {offsets = [88, 0], sizes = [16, 32], strides = [1, 1]} : vector<128x32xf32> to vector<16x32xf32>
    %18 = vector.extract_strided_slice %6 {offsets = [104, 0], sizes = [1, 32], strides = [1, 1]} : vector<128x32xf32> to vector<1x32xf32>
    %19 = vector.extract_strided_slice %6 {offsets = [112, 0], sizes = [1, 32], strides = [1, 1]} : vector<128x32xf32> to vector<1x32xf32>
    %20 = vector.extract_strided_slice %6 {offsets = [120, 0], sizes = [1, 1], strides = [1, 1]} : vector<128x32xf32> to vector<1x1xf32>
    %21 = vector.extract_strided_slice %7 {offsets = [0, 0], sizes = [32, 128], strides = [1, 1]} : vector<40x128xf32> to vector<32x128xf32>
    %22 = vector.extract_strided_slice %7 {offsets = [32, 0], sizes = [1, 128], strides = [1, 1]} : vector<40x128xf32> to vector<1x128xf32>
    %23 = vector.extract_strided_slice %8 {offsets = [0, 0], sizes = [32, 512], strides = [1, 1]} : vector<40x512xf32> to vector<32x512xf32>
    %24 = vector.extract_strided_slice %8 {offsets = [32, 0], sizes = [1, 512], strides = [1, 1]} : vector<40x512xf32> to vector<1x512xf32>
    %25 = tpu.iota {dimensions = array<i32: 0>} : vector<4x128xi32>
    %26 = tpu.iota {dimensions = array<i32: 1>} : vector<4x128xi32>
    %c32_i32 = arith.constant 32 : i32
    %27 = vector.broadcast %c32_i32 : i32 to vector<4x128xi32>
    %28 = arith.muli %25, %27 : vector<4x128xi32>
    %29 = arith.cmpi sge, %26, %28 : vector<4x128xi32>
    %c1_i32 = arith.constant 1 : i32
    %30 = vector.broadcast %c1_i32 : i32 to vector<4x128xi32>
    %31 = arith.addi %25, %30 : vector<4x128xi32>
    %c32_i32_13 = arith.constant 32 : i32
    %32 = vector.broadcast %c32_i32_13 : i32 to vector<4x128xi32>
    %33 = arith.muli %31, %32 : vector<4x128xi32>
    %34 = arith.cmpi slt, %26, %33 : vector<4x128xi32>
    %35 = arith.andi %29, %34 : vector<4x128xi1>
    %36 = arith.extui %35 : vector<4x128xi1> to vector<4x128xi32>
    %37 = arith.sitofp %36 : vector<4x128xi32> to vector<4x128xf32>
    %38 = tpu.iota {dimensions = array<i32: 0>} : vector<128x32xi32>
    %39 = tpu.iota {dimensions = array<i32: 1>} : vector<128x32xi32>
    %c31_i32 = arith.constant 31 : i32
    %40 = vector.broadcast %c31_i32 : i32 to vector<128x32xi32>
    %41 = arith.andi %38, %40 : vector<128x32xi32>
    %42 = arith.cmpi eq, %41, %39 : vector<128x32xi32>
    %43 = arith.extui %42 : vector<128x32xi1> to vector<128x32xi32>
    %44 = arith.sitofp %43 : vector<128x32xi32> to vector<128x32xf32>
    %45 = tpu.iota {dimensions = array<i32: 0>} : vector<32x512xi32>
    %46 = tpu.iota {dimensions = array<i32: 1>} : vector<32x512xi32>
    %c16_i32 = arith.constant 16 : i32
    %47 = vector.broadcast %c16_i32 : i32 to vector<32x512xi32>
    %48 = arith.muli %45, %47 : vector<32x512xi32>
    %49 = arith.cmpi sge, %46, %48 : vector<32x512xi32>
    %c1_i32_14 = arith.constant 1 : i32
    %50 = vector.broadcast %c1_i32_14 : i32 to vector<32x512xi32>
    %51 = arith.addi %45, %50 : vector<32x512xi32>
    %c16_i32_15 = arith.constant 16 : i32
    %52 = vector.broadcast %c16_i32_15 : i32 to vector<32x512xi32>
    %53 = arith.muli %51, %52 : vector<32x512xi32>
    %54 = arith.cmpi slt, %46, %53 : vector<32x512xi32>
    %55 = arith.andi %49, %54 : vector<32x512xi1>
    %56 = arith.extui %55 : vector<32x512xi1> to vector<32x512xi32>
    %57 = arith.sitofp %56 : vector<32x512xi32> to vector<32x512xf32>
    %58 = tpu.iota {dimensions = array<i32: 0>} : vector<512x16xi32>
    %59 = tpu.iota {dimensions = array<i32: 1>} : vector<512x16xi32>
    %c15_i32 = arith.constant 15 : i32
    %60 = vector.broadcast %c15_i32 : i32 to vector<512x16xi32>
    %61 = arith.andi %58, %60 : vector<512x16xi32>
    %62 = arith.cmpi eq, %61, %59 : vector<512x16xi32>
    %63 = arith.extui %62 : vector<512x16xi1> to vector<512x16xi32>
    %64 = arith.sitofp %63 : vector<512x16xi32> to vector<512x16xf32>
    %cst = arith.constant dense<0.000000e+00> : vector<32x32xf32>
    %65 = tpu.matmul %2, %9, %cst {dimension_numbers = #tpu.dot_dimension_numbers<[1], [0], [0], [1], [0, 0, 1, 1], [], []>} : vector<32x4xf32>, vector<4x32xf32>, vector<32x32xf32> -> vector<32x32xf32>
    %66 = vector.broadcast %10 : vector<1x32xf32> to vector<32x32xf32>
    %67 = arith.addf %65, %66 : vector<32x32xf32>
    %cst_16 = arith.constant 0.000000e+00 : f32
    %68 = vector.broadcast %cst_16 : f32 to vector<32x32xf32>
    %69 = arith.maximumf %67, %68 : vector<32x32xf32>
    %cst_17 = arith.constant dense<0.000000e+00> : vector<32x128xf32>
    %70 = tpu.matmul %69, %21, %cst_17 {dimension_numbers = #tpu.dot_dimension_numbers<[1], [0], [0], [1], [0, 0, 1, 1], [], []>} : vector<32x32xf32>, vector<32x128xf32>, vector<32x128xf32> -> vector<32x128xf32>
    %71 = vector.broadcast %22 : vector<1x128xf32> to vector<32x128xf32>
    %72 = arith.addf %70, %71 : vector<32x128xf32>
    %cst_18 = arith.constant dense<0.000000e+00> : vector<32x4xf32>
    %73 = tpu.matmul %3, %1, %cst_18 {dimension_numbers = #tpu.dot_dimension_numbers<[1], [0], [0], [1], [0, 0, 1, 1], [], []>} : vector<32x16xf32>, vector<16x4xf32>, vector<32x4xf32> -> vector<32x4xf32>
    %cst_19 = arith.constant dense<0.000000e+00> : vector<32x128xf32>
    %74 = tpu.matmul %73, %37, %cst_19 {dimension_numbers = #tpu.dot_dimension_numbers<[1], [0], [0], [1], [0, 0, 1, 1], [], []>} : vector<32x4xf32>, vector<4x128xf32>, vector<32x128xf32> -> vector<32x128xf32>
    %75 = arith.mulf %74, %72 : vector<32x128xf32>
    %cst_20 = arith.constant dense<0.000000e+00> : vector<32x32xf32>
    %76 = tpu.matmul %75, %44, %cst_20 {dimension_numbers = #tpu.dot_dimension_numbers<[1], [0], [0], [1], [0, 0, 1, 1], [], []>} : vector<32x128xf32>, vector<128x32xf32>, vector<32x32xf32> -> vector<32x32xf32>
    %cst_21 = arith.constant dense<0.000000e+00> : vector<16x32xf32>
    %77 = tpu.matmul %4, %76, %cst_21 {dimension_numbers = #tpu.dot_dimension_numbers<[1], [0], [0], [1], [0, 0, 1, 1], [], []>} : vector<16x32xf32>, vector<32x32xf32>, vector<16x32xf32> -> vector<16x32xf32>
    %cst_22 = arith.constant dense<0.000000e+00> : vector<16x32xf32>
    %78 = tpu.matmul %1, %11, %cst_22 {dimension_numbers = #tpu.dot_dimension_numbers<[1], [0], [0], [1], [0, 0, 1, 1], [], []>} : vector<16x4xf32>, vector<4x32xf32>, vector<16x32xf32> -> vector<16x32xf32>
    %79 = arith.addf %77, %78 : vector<16x32xf32>
    %80 = vector.broadcast %12 : vector<1x32xf32> to vector<16x32xf32>
    %81 = arith.addf %79, %80 : vector<16x32xf32>
    %cst_23 = arith.constant 0.000000e+00 : f32
    %82 = vector.broadcast %cst_23 : f32 to vector<16x32xf32>
    %83 = arith.maximumf %81, %82 : vector<16x32xf32>
    %cst_24 = arith.constant dense<0.000000e+00> : vector<32x32xf32>
    %84 = tpu.matmul %2, %13, %cst_24 {dimension_numbers = #tpu.dot_dimension_numbers<[1], [0], [0], [1], [0, 0, 1, 1], [], []>} : vector<32x4xf32>, vector<4x32xf32>, vector<32x32xf32> -> vector<32x32xf32>
    %85 = vector.broadcast %14 : vector<1x32xf32> to vector<32x32xf32>
    %86 = arith.addf %84, %85 : vector<32x32xf32>
    %cst_25 = arith.constant 0.000000e+00 : f32
    %87 = vector.broadcast %cst_25 : f32 to vector<32x32xf32>
    %88 = arith.maximumf %86, %87 : vector<32x32xf32>
    %cst_26 = arith.constant dense<0.000000e+00> : vector<32x512xf32>
    %89 = tpu.matmul %88, %23, %cst_26 {dimension_numbers = #tpu.dot_dimension_numbers<[1], [0], [0], [1], [0, 0, 1, 1], [], []>} : vector<32x32xf32>, vector<32x512xf32>, vector<32x512xf32> -> vector<32x512xf32>
    %90 = vector.broadcast %24 : vector<1x512xf32> to vector<32x512xf32>
    %91 = arith.addf %89, %90 : vector<32x512xf32>
    %cst_27 = arith.constant dense<0.000000e+00> : vector<32x32xf32>
    %92 = tpu.matmul %3, %83, %cst_27 {dimension_numbers = #tpu.dot_dimension_numbers<[1], [0], [0], [1], [0, 0, 1, 1], [], []>} : vector<32x16xf32>, vector<16x32xf32>, vector<32x32xf32> -> vector<32x32xf32>
    %cst_28 = arith.constant dense<0.000000e+00> : vector<32x512xf32>
    %93 = tpu.matmul %92, %57, %cst_28 {dimension_numbers = #tpu.dot_dimension_numbers<[1], [0], [0], [1], [0, 0, 1, 1], [], []>} : vector<32x32xf32>, vector<32x512xf32>, vector<32x512xf32> -> vector<32x512xf32>
    %94 = arith.mulf %93, %91 : vector<32x512xf32>
    %cst_29 = arith.constant dense<0.000000e+00> : vector<32x16xf32>
    %95 = tpu.matmul %94, %64, %cst_29 {dimension_numbers = #tpu.dot_dimension_numbers<[1], [0], [0], [1], [0, 0, 1, 1], [], []>} : vector<32x512xf32>, vector<512x16xf32>, vector<32x16xf32> -> vector<32x16xf32>
    %cst_30 = arith.constant dense<0.000000e+00> : vector<16x16xf32>
    %96 = tpu.matmul %4, %95, %cst_30 {dimension_numbers = #tpu.dot_dimension_numbers<[1], [0], [0], [1], [0, 0, 1, 1], [], []>} : vector<16x32xf32>, vector<32x16xf32>, vector<16x16xf32> -> vector<16x16xf32>
    %cst_31 = arith.constant dense<0.000000e+00> : vector<16x16xf32>
    %97 = tpu.matmul %83, %15, %cst_31 {dimension_numbers = #tpu.dot_dimension_numbers<[1], [0], [0], [1], [0, 0, 1, 1], [], []>} : vector<16x32xf32>, vector<32x16xf32>, vector<16x16xf32> -> vector<16x16xf32>
    %98 = arith.addf %96, %97 : vector<16x16xf32>
    %99 = vector.broadcast %16 : vector<1x16xf32> to vector<16x16xf32>
    %100 = arith.addf %98, %99 : vector<16x16xf32>
    %cst_32 = arith.constant 0.000000e+00 : f32
    %101 = vector.broadcast %cst_32 : f32 to vector<16x16xf32>
    %102 = arith.maximumf %100, %101 : vector<16x16xf32>
    %cst_33 = arith.constant dense<0.000000e+00> : vector<2x16xf32>
    %103 = tpu.matmul %5, %102, %cst_33 {dimension_numbers = #tpu.dot_dimension_numbers<[1], [0], [0], [1], [0, 0, 1, 1], [], []>} : vector<2x16xf32>, vector<16x16xf32>, vector<2x16xf32> -> vector<2x16xf32>
    %cst_34 = arith.constant dense<0.000000e+00> : vector<2x32xf32>
    %104 = tpu.matmul %103, %17, %cst_34 {dimension_numbers = #tpu.dot_dimension_numbers<[1], [0], [0], [1], [0, 0, 1, 1], [], []>} : vector<2x16xf32>, vector<16x32xf32>, vector<2x32xf32> -> vector<2x32xf32>
    %105 = vector.broadcast %18 : vector<1x32xf32> to vector<2x32xf32>
    %106 = arith.addf %104, %105 : vector<2x32xf32>
    %cst_35 = arith.constant 0.000000e+00 : f32
    %107 = vector.broadcast %cst_35 : f32 to vector<2x32xf32>
    %108 = arith.maximumf %106, %107 : vector<2x32xf32>
    %109 = vector.broadcast %19 : vector<1x32xf32> to vector<2x32xf32>
    %110 = arith.mulf %108, %109 : vector<2x32xf32>
    %cst_36 = arith.constant dense<0.000000e+00> : vector<2xf32>
    %111 = vector.multi_reduction <add>, %110, %cst_36 [1] : vector<2x32xf32> to vector<2xf32>
    %112 = vector.shape_cast %111 : vector<2xf32> to vector<2x1xf32>
    %113 = vector.broadcast %20 : vector<1x1xf32> to vector<2x1xf32>
    %114 = arith.addf %112, %113 : vector<2x1xf32>
    %c0_37 = arith.constant 0 : index
    %c0_38 = arith.constant 0 : index
    %115 = vector.load %arg7[%c0_37, %c0_38] : memref<2x1xf32, #tpu.memory_space<vmem>>, vector<2x1xf32>
    tpu.vector_store %arg7[%c0_37, %c0_38], %114 {strides = array<i32>} : memref<2x1xf32, #tpu.memory_space<vmem>>, vector<2x1xf32>,
    return
  }
}

</mosaic_0001>

<bundles_post_ra>
// kernel: examplenet_forward.1
= control target key start
LH: loop header
LB: loop body
LE: loop exit
PB: predicated region body
PF: predicated region fallthrough
CT: control target
= control target key end

     0   :  { %vm583_vm0 = vcmask 1043456   ;;  %vm570_vm1 = vcmask 31744   ;;  %vm2587_vm2 = vcmask 130048   ;;  %v80_v12 = vlaneseq  ;;  %s2579_s0 = inlined_call_operand.vmem [shape: f32[48,4], index: 0, kind: input, shape index: {}]   ;;  %s2580_s1 = inlined_call_operand.vmem [shape: f32[32,16], index: 1, kind: input, shape index: {}]   ;;  %s2581_s4 = inlined_call_operand.vmem [shape: f32[128,32], index: 4, kind: input, shape index: {}]   ;;  %s2582_s5 = inlined_call_operand.vmem [shape: f32[40,128], index: 5, kind: input, shape index: {}]   ;;  %s2583_s6 = inlined_call_operand.vmem [shape: f32[40,512], index: 6, kind: input, shape index: {}]   ;;  %s2584_s2 = inlined_call_operand.vmem [shape: f32[16,32], index: 2, kind: input, shape index: {}]   ;;  %s2585_s3 = inlined_call_operand.vmem [shape: f32[2,16], index: 3, kind: input, shape index: {}]   ;;  %s2586_s7 = inlined_call_operand.vmem [shape: f32[2,1], index: 7, kind: output, shape index: {}]  }
   0x1   :  { %v1737_v0 = vld [vmem:[%s2579_s0 + $0x8] sm:$0xff]  ;;  %v1742_v1 = vld [vmem:[%s2579_s0] sm:$0xff]  ;;  %v1756_v4 = vld [vmem:[%s2579_s0 + $0x10] sm:$0xff]  ;;  %v1692_v19 = vmov 0.0   ;;  %vm2588_vm6 = vcmask 261120   ;;  %v1693_v38 = vmov 1.0  }
   0x2   :  { %690 = vmatpush.msra.mxu2 %v1737_v0  ;;  %v1748_v2 = vld [vmem:[%s2580_s1] sm:$0xff]  ;;  %v58_v5 = vld [vmem:[%s2582_s5 + $0x18] sm:$0xff]  ;;  %v1775_v7 = vld [vmem:[%s2580_s1 + $0x8] sm:$0xff]  ;;  %v1809_v13 = vshrl.u32 %v80_v12, 7  ;;  %v1814_v15 = vand.u32 127, %v80_v12 }
   0x3   :  { %v39_v3 = vld [vmem:[%s2581_s4] sm:$0xff]  ;;  %646 = vmatpush.msra.mxu1 %v58_v5  ;;  %v1770_v6 = vld [vmem:[%s2579_s0 + $0x18] sm:$0xff]  ;;  %v1789_v9 = vld [vmem:[%s2580_s1 + $0x10] sm:$0xff] }
   0x4   :  { %1522 = vmatpush.msk.msra.mxu0 %vm583_vm0, %v39_v3  ;;  %691 = vmatpush.msra.mxu2 %v1742_v1  ;;  %v1784_v8 = vld [vmem:[%s2579_s0 + $0x20] sm:$0xff]  ;;  %v1798_v10 = vld [vmem:[%s2579_s0 + $0x28] sm:$0xff]  ;;  %v1803_v11 = vld [vmem:[%s2580_s1 + $0x18] sm:$0xff]  ;;  %v1812_v14 = vadd.s32 1, %v1809_v13  ;;  %v84_v16 = vmul.u32 32, %v1809_v13  ;;  %v1836_v26 = vadd.s32 120, %v1809_v13 }
   0x5   :  { %1523 = vmatmul.msk.f32.vlgmr.msra.gmra.mxu0 %vm570_vm1, %v1756_v4  ;;  %1531 = vmatmul.msk.f32.vlgmr.msra.gmra.mxu2 %vm2587_vm2, %v1748_v2  ;;  %v57_v18 = vld [vmem:[%s2582_s5 + $0x10] sm:$0xff]  ;;  %v56_v21 = vld [vmem:[%s2582_s5 + $0x8] sm:$0xff]  ;;  %v55_v22 = vld [vmem:[%s2582_s5] sm:$0xff]  ;;  %v1839_v27 = vadd.s32 112, %v1809_v13  ;;  %v1842_v28 = vadd.s32 104, %v1809_v13  ;;  %v1846_v30 = vadd.s32 96, %v1809_v13 }
   0x6   :  { %v87_v17 = vmul.u32 32, %v1812_v14  ;;  %647 = vmatpush.msra.mxu1 %v57_v18  ;;  %vm85_vm3 = vcmp.ge.s32.totalorder %v1814_v15, %v84_v16  ;;  %v40_v23 = vld [vmem:[%s2581_s4 + $0x8] sm:$0xff]  ;;  %v122_v31 = vand.u32 31, %v1836_v26  ;;  %v1852_v34 = vadd.s32 88, %v1809_v13 }
   0x7   :  { %v1833_v24 = vperm.slane %v40_v23, 0  ;;  %v121_v32 = vand.u32 31, %v1839_v27  ;;  %v120_v33 = vand.u32 31, %v1842_v28  ;;  %v119_v36 = vand.u32 31, %v1846_v30 }
   0x8   :  { %vm88_vm4 = vcmp.lt.s32.totalorder %v1814_v15, %v87_v17  ;;  %648 = vmatpush.msra.mxu1 %v56_v21  ;;  %vm138_vm7 = vcmp.eq.s32.totalorder %v122_v31, %v1814_v15  ;;  %v1858_v37 = vadd.s32 80, %v1809_v13  ;;  %v118_v39 = vand.u32 31, %v1852_v34 }
   0x9   :  { %vm89_vm5 = vmand %vm85_vm3, %vm88_vm4  ;;  %vm137_vm8 = vcmp.eq.s32.totalorder %v121_v32, %v1814_v15  ;;  %1540 = vmatpush.msk.msrb.mxu0 %vm138_vm7, %v1693_v38  ;;  %vm136_vm9 = vcmp.eq.s32.totalorder %v120_v33, %v1814_v15  ;;  %v1865_v40 = vadd.s32 72, %v1809_v13  ;;  %vm135_vm10 = vcmp.eq.s32.totalorder %v119_v36, %v1814_v15 }
   0xa   :  { %v1425_v20 = vsel %vm89_vm5, 1.0, %v1692_v19  ;;  %649 = vmatpush.msra.mxu1 %v55_v22  ;;  %v117_v43 = vand.u32 31, %v1858_v37  ;;  %v1872_v44 = vadd.s32 64, %v1809_v13  ;;  %vm134_vm11 = vcmp.eq.s32.totalorder %v118_v39, %v1814_v15  ;;  %v59_v22 = vld [vmem:[%s2582_s5 + $0x20] sm:$0xff] }
   0xb   :  { %1535 = vmatpush.msk.msra.mxu3 %vm583_vm0, %v1425_v20  ;;  %1541 = vmatpush.msk.msrb.mxu0 %vm137_vm8, %v1693_v38  ;;  %v116_v46 = vand.u32 31, %v1865_v40  ;;  %v1879_v47 = vadd.s32 56, %v1809_v13  ;;  %v1885_v50 = vadd.s32 48, %v1809_v13  ;;  %v1892_v52 = vadd.s32 40, %v1809_v13 }
   0xc   :  { %vm133_vm12 = vcmp.eq.s32.totalorder %v117_v43, %v1814_v15  ;;  %v115_v49 = vand.u32 31, %v1872_v44  ;;  %v1899_v56 = vadd.s32 32, %v1809_v13  ;;  %v1906_v59 = vadd.s32 24, %v1809_v13 }
   0xd   :  { %1524 = vmatmul.msk.f32.gmra.mxu0 %vm570_vm1, %v1770_v6  ;;  %1532 = vmatmul.msk.f32.gmra.mxu2 %vm2587_vm2, %v1775_v7  ;;  %vm132_vm13 = vcmp.eq.s32.totalorder %v116_v46, %v1814_v15  ;;  %v114_v51 = vand.u32 31, %v1879_v47  ;;  %v113_v55 = vand.u32 31, %v1885_v50  ;;  %v112_v58 = vand.u32 31, %v1892_v52 }
   0xe   :  { %1542 = vmatpush.msk.msrb.mxu0 %vm136_vm9, %v1693_v38  ;;  %vm131_vm14 = vcmp.eq.s32.totalorder %v115_v49, %v1814_v15  ;;  %v111_v61 = vand.u32 31, %v1899_v56  ;;  %v110_v62 = vand.u32 31, %v1906_v59  ;;  %v1926_v17 = vadd.s32 16, %v1809_v13 }
   0xf   :  { %vm130_vm15 = vcmp.eq.s32.totalorder %v114_v51, %v1814_v15  ;;  %vm129_vm3 = vcmp.eq.s32.totalorder %v113_v55, %v1814_v15  ;;  %vm128_vm4 = vcmp.eq.s32.totalorder %v112_v58, %v1814_v15  ;;  %v1930_v19 = vadd.s32 8, %v1809_v13  ;;  %v43_v51 = vld [vmem:[%s2581_s4 + $0x20] sm:$0xff]  ;;  %v73_v58 = vld [vmem:[%s2583_s6 + $0x68] sm:$0xff] }
  0x10   :  { %1543 = vmatpush.msk.msrb.mxu0 %vm135_vm10, %v1693_v38  ;;  %vm127_vm5 = vcmp.eq.s32.totalorder %v111_v61, %v1814_v15  ;;  %vm126_vm7 = vcmp.eq.s32.totalorder %v110_v62, %v1814_v15  ;;  %v109_v18 = vand.u32 31, %v1926_v17  ;;  %v107_v21 = vand.u32 31, %v1809_v13  ;;  %1561 = vmatpush.msk.msrb.mxu1 %vm583_vm0, %v43_v51  ;;  %v75_v61 = vld [vmem:[%s2583_s6 + $0x78] sm:$0xff]  ;;  %v60_v62 = vld [vmem:[%s2583_s6] sm:$0xff] }
  0x11   :  { %v108_v20 = vand.u32 31, %v1930_v19 }
  0x12   :  { %1544 = vmatpush.msk.msrb.mxu0 %vm134_vm11, %v1693_v38  ;;  %vm125_vm8 = vcmp.eq.s32.totalorder %v109_v18, %v1814_v15  ;;  %vm123_vm10 = vcmp.eq.s32.totalorder %v107_v21, %v1814_v15  ;;  %v67_v18 = vld [vmem:[%s2583_s6 + $0x38] sm:$0xff]  ;;  %v62_v21 = vld [vmem:[%s2583_s6 + $0x10] sm:$0xff] }
  0x13   :  { %vm124_vm9 = vcmp.eq.s32.totalorder %v108_v20, %v1814_v15  ;;  %v61_v20 = vld [vmem:[%s2583_s6 + $0x8] sm:$0xff] }
  0x14   :  { %1545 = vmatpush.msk.msrb.mxu0 %vm133_vm12, %v1693_v38 }
  0x15   :  { %1525 = vmatmul.msk.f32.gmra.mxu0 %vm570_vm1, %v1784_v8  ;;  %1533 = vmatmul.msk.f32.gmra.mxu2 %vm2587_vm2, %v1789_v9 }
  0x16   :  { %1546 = vmatpush.msk.msrb.mxu0 %vm132_vm13, %v1693_v38 }
  0x18   :  { %1547 = vmatpush.msk.msrb.mxu0 %vm131_vm14, %v1693_v38 }
  0x1a   :  { %1548 = vmatpush.msk.msrb.mxu0 %vm130_vm15, %v1693_v38 }
  0x1c   :  { %1549 = vmatpush.msk.msrb.mxu0 %vm129_vm3, %v1693_v38 }
  0x1d   :  { %1526 = vmatmul.msk.f32.gmra.mxu0 %vm570_vm1, %v1798_v10  ;;  %1534 = vmatmul.msk.f32.gmra.mxu2 %vm2587_vm2, %v1803_v11 }
  0x1e   :  { %1550 = vmatpush.msk.msrb.mxu0 %vm128_vm4, %v1693_v38 }
  0x20   :  { %1551 = vmatpush.msk.msrb.mxu0 %vm127_vm5, %v1693_v38 }
  0x22   :  { %1552 = vmatpush.msk.msrb.mxu0 %vm126_vm7, %v1693_v38 }
  0x24   :  { %1553 = vmatpush.msk.msrb.mxu0 %vm125_vm8, %v1693_v38 }
  0x26   :  { %1554 = vmatpush.msk.msrb.mxu0 %vm124_vm9, %v1693_v38 }
  0x28   :  { %1555 = vmatpush.msk.msrb.mxu0 %vm123_vm10, %v1693_v38 }
  0x82   :  { %v604_v25 = vpop.f32.mrf.mxu0 }
  0x83   :  { %v605_v29 = vadd.f32 %v604_v25, %v1833_v24 }
  0x85   :  { %v616_v35 = vmax.f32 %v605_v29, 0.0 }
  0x87   :  { %1527 = vmatmul.msk.f32.vlgmr.msra.gmra.mxu1 %vm2588_vm6, %v616_v35 }
  0x88   :  { %v693_v41 = vpop.f32.mrf.mxu2  ;;  %1000 = vmatpush.msra.mxu1 %v75_v61 }
  0x89   :  { %1536 = vmatmul.msk.f32.vlgmr.msra.gmra.mxu3 %vm570_vm1, %v693_v41 }
  0x8a   :  { %v607_v42 = vpop.f32.mrf.mxu0 }
  0x8b   :  { %v608_v45 = vadd.f32 %v607_v42, %v1833_v24 }
  0x8d   :  { %v617_v48 = vmax.f32 %v608_v45, 0.0 }
  0x8f   :  { %1528 = vmatmul.msk.f32.gmra.mxu1 %vm2588_vm6, %v617_v48 }
  0x90   :  { %v696_v53 = vpop.f32.mrf.mxu2 }
  0x91   :  { %1537 = vmatmul.msk.f32.gmra.mxu3 %vm570_vm1, %v696_v53  ;;  %v41_v53 = vld [vmem:[%s2581_s4 + $0x10] sm:$0xff] }
  0x92   :  { %v610_v54 = vpop.f32.mrf.mxu0  ;;  %1556 = vmatpush.msk.msrb.mxu3 %vm583_vm0, %v41_v53 }
  0x93   :  { %v611_v57 = vadd.f32 %v610_v54, %v1833_v24 }
  0x95   :  { %v618_v60 = vmax.f32 %v611_v57, 0.0 }
  0x97   :  { %1529 = vmatmul.msk.f32.gmra.mxu1 %vm2588_vm6, %v618_v60  ;;  %v74_v60 = vld [vmem:[%s2583_s6 + $0x70] sm:$0xff] }
  0x98   :  { %v699_v63 = vpop.f32.mrf.mxu2  ;;  %971 = vmatpush.msra.mxu0 %v74_v60  ;;  %v2065_v60 = vadd.s32 256, %v1814_v15 }
  0x99   :  { %1538 = vmatmul.msk.f32.gmra.mxu3 %vm570_vm1, %v699_v63  ;;  %v69_v63 = vld [vmem:[%s2583_s6 + $0x48] sm:$0xff] }
  0x9a   :  { %v613_v3 = vpop.f32.mrf.mxu0 }
  0x9b   :  { %v614_v5 = vadd.f32 %v613_v3, %v1833_v24  ;;  %v620_v24 = vperm.slane %v59_v22, 0  ;;  %v70_v3 = vld [vmem:[%s2583_s6 + $0x50] sm:$0xff]  ;;  %v63_v22 = vld [vmem:[%s2583_s6 + $0x18] sm:$0xff] }
  0x9c   :  { %972 = vmatpush.msra.mxu0 %v70_v3 }
  0x9d   :  { %v619_v12 = vmax.f32 %v614_v5, 0.0  ;;  %v71_v5 = vld [vmem:[%s2583_s6 + $0x58] sm:$0xff] }
  0x9e   :  { %1001 = vmatpush.msra.mxu1 %v71_v5 }
  0x9f   :  { %1530 = vmatmul.msk.f32.gmra.mxu1 %vm2588_vm6, %v619_v12  ;;  %v65_v12 = vld [vmem:[%s2583_s6 + $0x28] sm:$0xff] }
  0xa0   :  { %v702_v16 = vpop.f32.mrf.mxu2  ;;  %1002 = vmatpush.msra.mxu1 %v67_v18 }
  0xa1   :  { %1539 = vmatmul.msk.f32.gmra.mxu3 %vm570_vm1, %v702_v16  ;;  %v66_v16 = vld [vmem:[%s2583_s6 + $0x30] sm:$0xff] }
  0xa2   :  { %973 = vmatpush.msra.mxu0 %v66_v16  ;;  %1003 = vmatpush.msra.mxu1 %v63_v22  ;;  %v174_v16 = vmul.u32 16, %v1809_v13  ;;  %v296_v22 = vadd.s32 376, %v1809_v13 }
  0xa4   :  { %974 = vmatpush.msra.mxu0 %v62_v21  ;;  %v280_v21 = vadd.s32 248, %v1809_v13 }
  0xa7   :  { %1562 = vmatmul.msk.f32.vlgmr.msrb.gmra.mxu1 %vm570_vm1, %v1756_v4 }
  0xa9   :  { %1557 = vmatmul.msk.f32.vlgmr.msrb.gmra.mxu3 %vm570_vm1, %v1742_v1  ;;  %v36_v1 = vld [vmem:[%s2584_s2] sm:$0xff] }
  0xaf   :  { %1563 = vmatmul.msk.f32.gmra.mxu1 %vm570_vm1, %v1770_v6  ;;  %v72_v6 = vld [vmem:[%s2583_s6 + $0x60] sm:$0xff] }
  0xb0   :  { %913 = vmatpush.msra.mxu3 %v72_v6 }
  0xb1   :  { %1558 = vmatmul.msk.f32.gmra.mxu3 %vm570_vm1, %v1737_v0  ;;  %v37_v0 = vld [vmem:[%s2584_s2 + $0x8] sm:$0xff] }
  0xb7   :  { %1564 = vmatmul.msk.f32.gmra.mxu1 %vm570_vm1, %v1784_v8  ;;  %v68_v8 = vld [vmem:[%s2583_s6 + $0x40] sm:$0xff] }
  0xb8   :  { %914 = vmatpush.msra.mxu3 %v68_v8  ;;  %v177_v8 = vmul.u32 16, %v1906_v59 }
  0xba   :  { %vm190_vm0 = vcmp.ge.s32.totalorder %v1814_v15, %v177_v8  ;;  %vm192_vm13 = vcmp.ge.s32.totalorder %v2065_v60, %v177_v8 }
  0xbf   :  { %1565 = vmatmul.msk.f32.gmra.mxu1 %vm570_vm1, %v1798_v10  ;;  %v64_v10 = vld [vmem:[%s2583_s6 + $0x20] sm:$0xff] }
  0xc0   :  { %915 = vmatpush.msra.mxu3 %v64_v10  ;;  %v196_v10 = vadd.s32 1, %v1906_v59 }
  0xc2   :  { %916 = vmatpush.msra.mxu3 %v60_v62  ;;  %v175_v62 = vmul.u32 16, %v1930_v19 }
 0x104   :  { %v651_v23 = vpop.f32.mrf.mxu1 }
 0x105   :  { %v652_v25 = vadd.f32 %v651_v23, %v620_v24  ;;  %v44_v23 = vld [vmem:[%s2581_s4 + $0x28] sm:$0xff] }
 0x10c   :  { %v654_v29 = vpop.f32.mrf.mxu1  ;;  %v737_v31 = vpop.f32.mrf.mxu3 }
 0x10d   :  { %v749_v32 = vmul.f32 %v737_v31, %v652_v25  ;;  %v655_v33 = vadd.f32 %v654_v29, %v620_v24 }
 0x10f   :  { %769 = vmatmul.f32.vlgmr.msrb.gmra.mxu0 %v749_v32 }
 0x114   :  { %v740_v35 = vpop.f32.mrf.mxu3  ;;  %v657_v36 = vpop.f32.mrf.mxu1 }
 0x115   :  { %v750_v39 = vmul.f32 %v740_v35, %v655_v33  ;;  %v658_v41 = vadd.f32 %v657_v36, %v620_v24 }
 0x117   :  { %772 = vmatmul.f32.gmra.mxu0 %v750_v39 }
 0x11c   :  { %v743_v42 = vpop.f32.mrf.mxu3  ;;  %v660_v45 = vpop.f32.mrf.mxu1 }
 0x11d   :  { %v751_v43 = vmul.f32 %v743_v42, %v658_v41  ;;  %v661_v46 = vadd.f32 %v660_v45, %v620_v24  ;;  %v848_v24 = vperm.slane %v44_v23, 0  ;;  %v279_v23 = vadd.s32 240, %v1809_v13 }
 0x11f   :  { %775 = vmatmul.f32.gmra.mxu0 %v751_v43 }
 0x124   :  { %v746_v48 = vpop.f32.mrf.mxu3  ;;  %v869_v25 = vpop.f32.mrf.mxu1 }
 0x125   :  { %v752_v49 = vmul.f32 %v746_v48, %v661_v46  ;;  %v870_v29 = vadd.f32 %v869_v25, %v848_v24  ;;  %v278_v25 = vadd.s32 232, %v1809_v13 }
 0x127   :  { %778 = vmatmul.f32.gmra.mxu0 %v752_v49  ;;  %v881_v31 = vmax.f32 %v870_v29, 0.0  ;;  %v42_v49 = vld [vmem:[%s2581_s4 + $0x18] sm:$0xff]  ;;  %v294_v29 = vadd.s32 360, %v1809_v13 }
 0x129   :  { %1566 = vmatmul.msk.f32.vlgmr.msra.gmra.mxu3 %vm2588_vm6, %v881_v31  ;;  %1578 = vmatmul.msk.f32.vlgmr.msra.gmra.mxu1 %vm2588_vm6, %v881_v31 }
 0x12c   :  { %v872_v32 = vpop.f32.mrf.mxu1  ;;  %v808_v46 = vpop.f32.mrf.mxu3 }
 0x12d   :  { %v873_v33 = vadd.f32 %v872_v32, %v848_v24  ;;  %v277_v32 = vadd.s32 224, %v1809_v13 }
 0x12f   :  { %1574 = vmatmul.msk.f32.vlgmr.msra.gmra.mxu0 %vm2588_vm6, %v881_v31  ;;  %v882_v35 = vmax.f32 %v873_v33, 0.0  ;;  %v344_v33 = vand.u32 15, %v280_v21  ;;  %v325_v21 = vand.u32 15, %v1846_v30 }
 0x131   :  { %1567 = vmatmul.msk.f32.gmra.mxu3 %vm2588_vm6, %v882_v35  ;;  %1579 = vmatmul.msk.f32.gmra.mxu1 %vm2588_vm6, %v882_v35 }
 0x134   :  { %v875_v36 = vpop.f32.mrf.mxu1  ;;  %v811_v51 = vpop.f32.mrf.mxu3 }
 0x135   :  { %v876_v39 = vadd.f32 %v875_v36, %v848_v24  ;;  %v343_v36 = vand.u32 15, %v279_v23  ;;  %v274_v23 = vadd.s32 200, %v1809_v13 }
 0x137   :  { %1575 = vmatmul.msk.f32.gmra.mxu0 %vm2588_vm6, %v882_v35  ;;  %v883_v41 = vmax.f32 %v876_v39, 0.0 }
 0x139   :  { %1568 = vmatmul.msk.f32.gmra.mxu3 %vm2588_vm6, %v883_v41  ;;  %1580 = vmatmul.msk.f32.gmra.mxu1 %vm2588_vm6, %v883_v41 }
 0x13c   :  { %v878_v42 = vpop.f32.mrf.mxu1 }
 0x13d   :  { %v879_v43 = vadd.f32 %v878_v42, %v848_v24  ;;  %v295_v24 = vadd.s32 368, %v1809_v13  ;;  %v358_v42 = vand.u32 15, %v294_v29  ;;  %v324_v29 = vand.u32 15, %v1852_v34 }
 0x13e   :  { %v268_v34 = vadd.s32 152, %v1809_v13 }
 0x13f   :  { %1576 = vmatmul.msk.f32.gmra.mxu0 %vm2588_vm6, %v883_v41  ;;  %v884_v45 = vmax.f32 %v879_v43, 0.0  ;;  %v359_v39 = vand.u32 15, %v295_v24  ;;  %v290_v24 = vadd.s32 328, %v1809_v13  ;;  %v289_v43 = vadd.s32 320, %v1809_v13 }
 0x141   :  { %1569 = vmatmul.msk.f32.gmra.mxu3 %vm2588_vm6, %v884_v45  ;;  %1581 = vmatmul.msk.f32.gmra.mxu1 %vm2588_vm6, %v884_v45 }
 0x147   :  { %1577 = vmatmul.msk.f32.gmra.mxu0 %vm2588_vm6, %v884_v45 }
 0x18c   :  { %v770_v54 = vpop.f32.mrf.mxu0 }
 0x194   :  { %v773_v4 = vpop.f32.mrf.mxu0 }
 0x19c   :  { %v776_v55 = vpop.f32.mrf.mxu0 }
 0x1a4   :  { %v779_v57 = vpop.f32.mrf.mxu0 }
 0x1a5   :  { %832 = vmatpush.msrb.mxu2 %v779_v57 }
 0x1a7   :  { %833 = vmatpush.msrb.mxu2 %v776_v55 }
 0x1a9   :  { %834 = vmatpush.msrb.mxu2 %v773_v4 }
 0x1ab   :  { %835 = vmatpush.msrb.mxu2 %v770_v54  ;;  %v843_v54 = vperm.slane %v42_v49, 0  ;;  %v293_v49 = vadd.s32 352, %v1809_v13 }
 0x1ac   :  { %1559 = vmatmul.msk.f32.vlgmr.msrb.gmra.mxu2 %vm2588_vm6, %v36_v1  ;;  %v2110_v5 = vpop.f32.mrf.mxu3 }
 0x1ad   :  { %942 = vmatpush.msra.mxu2 %v73_v58  ;;  %v2062_v58 = vadd.s32 128, %v1814_v15 }
 0x1af   :  { %943 = vmatpush.msra.mxu2 %v69_v63  ;;  %vm191_vm1 = vcmp.ge.s32.totalorder %v2062_v58, %v177_v8  ;;  %v194_v63 = vadd.s32 1, %v1930_v19 }
 0x1b1   :  { %944 = vmatpush.msra.mxu2 %v65_v12  ;;  %v198_v3 = vmul.u32 16, %v194_v63  ;;  %v197_v12 = vmul.u32 16, %v1812_v14  ;;  %v291_v63 = vadd.s32 336, %v1809_v13 }
 0x1b3   :  { %945 = vmatpush.msra.mxu2 %v61_v20 }
 0x1b4   :  { %1560 = vmatmul.msk.f32.gmra.mxu2 %vm2588_vm6, %v37_v0  ;;  %v2124_v14 = vpop.f32.mrf.mxu3 }
 0x1bc   :  { %1570 = vmatmul.msk.f32.vlgmr.msra.gmra.mxu2 %vm2588_vm6, %v881_v31  ;;  %v2128_v18 = vpop.f32.mrf.mxu3  ;;  %v328_v31 = vand.u32 15, %v1836_v26  ;;  %v341_v26 = vand.u32 15, %v277_v32 }
 0x1c4   :  { %1571 = vmatmul.msk.f32.gmra.mxu2 %vm2588_vm6, %v882_v35  ;;  %v2130_v20 = vpop.f32.mrf.mxu3  ;;  %v360_v35 = vand.u32 15, %v296_v22  ;;  %v355_v22 = vand.u32 15, %v291_v63  ;;  %v321_v63 = vand.u32 15, %v1872_v44  ;;  %v314_v44 = vand.u32 15, %v1930_v19 }
 0x1cc   :  { %1572 = vmatmul.msk.f32.gmra.mxu2 %vm2588_vm6, %v883_v41  ;;  %v342_v41 = vand.u32 15, %v278_v25  ;;  %v309_v25 = vadd.s32 480, %v1809_v13 }
 0x1d4   :  { %1573 = vmatmul.msk.f32.gmra.mxu2 %vm2588_vm6, %v884_v45  ;;  %vm206_vm6 = vcmp.lt.s32.totalorder %v2062_v58, %v198_v3 }
 0x22f   :  { %v837_v48 = vpop.f32.mrf.mxu2 }
 0x230   :  { %v838_v53 = vadd.f32 %v837_v48, %v808_v46  ;;  %v308_v48 = vadd.s32 472, %v1809_v13  ;;  %v332_v46 = vand.u32 15, %v268_v34 }
 0x232   :  { %v2041_v55 = vadd.f32 %v843_v54, %v838_v53  ;;  %v312_v53 = vadd.s32 504, %v1809_v13 }
 0x234   :  { %v846_v0 = vmax.f32 %v2041_v55, 0.0 }
 0x237   :  { %v840_v4 = vpop.f32.mrf.mxu2 }
 0x238   :  { %v841_v6 = vadd.f32 %v840_v4, %v811_v51  ;;  %v276_v4 = vadd.s32 216, %v1809_v13 }
 0x23a   :  { %v2043_v57 = vadd.f32 %v843_v54, %v841_v6  ;;  %v327_v54 = vand.u32 15, %v1839_v27  ;;  %v292_v6 = vadd.s32 344, %v1809_v13  ;;  %v376_v27 = vand.u32 15, %v312_v53 }
 0x23b   :  { %v323_v53 = vand.u32 15, %v1858_v37  ;;  %v2450_v37 = vpop.f32.mrf.mxu1 }
 0x23c   :  { %v847_v1 = vmax.f32 %v2043_v57, 0.0 }
 0x23e   :  { %1031 = vmatpush.msrb.mxu3 %v847_v1 }
 0x240   :  { %1032 = vmatpush.msrb.mxu3 %v846_v0 }
 0x241   :  { %1582 = vmatmul.msk.f32.vlgmr.msrb.gmra.mxu3 %vm2587_vm2, %v1748_v2  ;;  %v2068_v2 = vadd.s32 384, %v1814_v15 }
 0x243   :  { %vm193_vm3 = vcmp.ge.s32.totalorder %v2068_v2, %v177_v8  ;;  %v357_v8 = vand.u32 15, %v293_v49  ;;  %v318_v49 = vand.u32 15, %v1892_v52  ;;  %v302_v52 = vadd.s32 424, %v1809_v13 }
 0x249   :  { %1583 = vmatmul.msk.f32.gmra.mxu3 %vm2587_vm2, %v1775_v7  ;;  %v195_v7 = vadd.s32 1, %v1926_v17 }
 0x24b   :  { %v199_v61 = vmul.u32 16, %v195_v7  ;;  %v356_v7 = vand.u32 15, %v292_v6  ;;  %v288_v6 = vadd.s32 312, %v1809_v13 }
 0x24d   :  { %vm209_vm9 = vcmp.lt.s32.totalorder %v1814_v15, %v199_v61 }
 0x251   :  { %1584 = vmatmul.msk.f32.gmra.mxu3 %vm2587_vm2, %v1789_v9  ;;  %v200_v9 = vmul.u32 16, %v196_v10  ;;  %v311_v10 = vadd.s32 496, %v1809_v13 }
 0x253   :  { %vm213_vm11 = vcmp.lt.s32.totalorder %v1814_v15, %v200_v9  ;;  %vm214_vm12 = vcmp.lt.s32.totalorder %v2062_v58, %v200_v9  ;;  %vm215_vm14 = vcmp.lt.s32.totalorder %v2065_v60, %v200_v9  ;;  %vm216_vm4 = vcmp.lt.s32.totalorder %v2068_v2, %v200_v9 }
 0x254   :  { %vm229_vm15 = vmand %vm190_vm0, %vm213_vm11  ;;  %vm210_vm0 = vcmp.lt.s32.totalorder %v2062_v58, %v199_v61  ;;  %v306_v9 = vadd.s32 456, %v1809_v13 }
 0x255   :  { %1586 = vmatpush.msk.msrb.mxu2 %vm229_vm15, %v1693_v38  ;;  %vm230_vm5 = vmand %vm191_vm1, %vm214_vm12  ;;  %vm211_vm12 = vcmp.lt.s32.totalorder %v2065_v60, %v199_v61 }
 0x256   :  { %1594 = vmatpush.msk.msrb.mxu0 %vm230_vm5, %v1693_v38  ;;  %vm231_vm8 = vmand %vm192_vm13, %vm215_vm14  ;;  %vm212_vm13 = vcmp.lt.s32.totalorder %v2068_v2, %v199_v61  ;;  %v300_v61 = vadd.s32 408, %v1809_v13 }
 0x257   :  { %1602 = vmatpush.msk.msrb.mxu1 %vm231_vm8, %v1693_v38  ;;  %vm232_vm11 = vmand %vm193_vm3, %vm216_vm4  ;;  %vm205_vm8 = vcmp.lt.s32.totalorder %v1814_v15, %v198_v3  ;;  %vm183_vm4 = vcmp.ge.s32.totalorder %v2062_v58, %v175_v62 }
 0x258   :  { %1610 = vmatpush.msk.msra.mxu3 %vm232_vm11, %v1693_v38  ;;  %vm207_vm11 = vcmp.lt.s32.totalorder %v2065_v60, %v198_v3 }
 0x259   :  { %1585 = vmatmul.msk.f32.gmra.mxu3 %vm2587_vm2, %v1803_v11  ;;  %v176_v11 = vmul.u32 16, %v1926_v17  ;;  %vm182_vm2 = vcmp.ge.s32.totalorder %v1814_v15, %v175_v62 }
 0x25b   :  { %vm186_vm7 = vcmp.ge.s32.totalorder %v1814_v15, %v176_v11  ;;  %vm187_vm10 = vcmp.ge.s32.totalorder %v2062_v58, %v176_v11  ;;  %vm188_vm1 = vcmp.ge.s32.totalorder %v2065_v60, %v176_v11  ;;  %vm189_vm5 = vcmp.ge.s32.totalorder %v2068_v2, %v176_v11 }
 0x25c   :  { %vm225_vm15 = vmand %vm186_vm7, %vm209_vm9  ;;  %vm184_vm9 = vcmp.ge.s32.totalorder %v2065_v60, %v175_v62  ;;  %v375_v11 = vand.u32 15, %v311_v10  ;;  %v322_v10 = vand.u32 15, %v1865_v40  ;;  %v352_v40 = vand.u32 15, %v288_v6 }
 0x25d   :  { %1587 = vmatpush.msk.msrb.mxu2 %vm225_vm15, %v1693_v38  ;;  %vm226_vm14 = vmand %vm187_vm10, %vm210_vm0  ;;  %vm185_vm0 = vcmp.ge.s32.totalorder %v2068_v2, %v175_v62  ;;  %vm208_vm15 = vcmp.lt.s32.totalorder %v2068_v2, %v198_v3  ;;  %v270_v3 = vadd.s32 168, %v1809_v13 }
 0x25e   :  { %1595 = vmatpush.msk.msrb.mxu0 %vm226_vm14, %v1693_v38  ;;  %vm227_vm3 = vmand %vm188_vm1, %vm211_vm12  ;;  %vm202_vm14 = vcmp.lt.s32.totalorder %v2062_v58, %v197_v12 }
 0x25f   :  { %1603 = vmatpush.msk.msrb.mxu1 %vm227_vm3, %v1693_v38  ;;  %vm228_vm7 = vmand %vm189_vm5, %vm212_vm13  ;;  %vm201_vm13 = vcmp.lt.s32.totalorder %v1814_v15, %v197_v12  ;;  %vm180_vm3 = vcmp.ge.s32.totalorder %v2065_v60, %v174_v16 }
 0x260   :  { %1611 = vmatpush.msk.msra.mxu3 %vm228_vm7, %v1693_v38  ;;  %vm221_vm10 = vmand %vm182_vm2, %vm205_vm8  ;;  %vm178_vm2 = vcmp.ge.s32.totalorder %v1814_v15, %v174_v16  ;;  %vm181_vm7 = vcmp.ge.s32.totalorder %v2068_v2, %v174_v16 }
 0x261   :  { %1588 = vmatpush.msk.msrb.mxu2 %vm221_vm10, %v1693_v38  ;;  %vm222_vm1 = vmand %vm183_vm4, %vm206_vm6  ;;  %vm179_vm6 = vcmp.ge.s32.totalorder %v2062_v58, %v174_v16  ;;  %vm203_vm4 = vcmp.lt.s32.totalorder %v2065_v60, %v197_v12  ;;  %v326_v58 = vand.u32 15, %v1842_v28  ;;  %v275_v60 = vadd.s32 208, %v1809_v13 }
 0x262   :  { %1596 = vmatpush.msk.msrb.mxu0 %vm222_vm1, %v1693_v38  ;;  %vm223_vm12 = vmand %vm184_vm9, %vm207_vm11  ;;  %vm204_vm9 = vcmp.lt.s32.totalorder %v2068_v2, %v197_v12  ;;  %vm408_vm1 = vcmp.eq.s32.totalorder %v344_v33, %v1814_v15  ;;  %v340_v2 = vand.u32 15, %v276_v4  ;;  %v310_v16 = vadd.s32 488, %v1809_v13 }
 0x263   :  { %1604 = vmatpush.msk.msrb.mxu1 %vm223_vm12, %v1693_v38  ;;  %vm224_vm5 = vmand %vm185_vm0, %vm208_vm15  ;;  %vm392_vm15 = vcmp.eq.s32.totalorder %v328_v31, %v1814_v15  ;;  %vm424_vm12 = vcmp.eq.s32.totalorder %v360_v35, %v1814_v15  ;;  %v339_v62 = vand.u32 15, %v275_v60  ;;  %v273_v31 = vadd.s32 192, %v1809_v13 }
 0x264   :  { %1612 = vmatpush.msk.msra.mxu3 %vm224_vm5, %v1693_v38  ;;  %vm217_vm8 = vmand %vm178_vm2, %vm201_vm13  ;;  %vm2144_vm5 = vcmp.eq.s32.totalorder %v343_v36, %v1814_v15  ;;  %vm2152_vm2 = vcmp.eq.s32.totalorder %v359_v39, %v1814_v15  ;;  %vm2157_vm13 = vcmp.eq.s32.totalorder %v342_v41, %v1814_v15  ;;  %v374_v30 = vand.u32 15, %v310_v16 }
 0x265   :  { %1589 = vmatpush.msk.msrb.mxu2 %vm217_vm8, %v1693_v38  ;;  %vm218_vm11 = vmand %vm179_vm6, %vm202_vm14  ;;  %vm2162_vm6 = vcmp.eq.s32.totalorder %v358_v42, %v1814_v15  ;;  %vm2597_vm14 = vcmask 261120   ;;  %v338_v35 = vand.u32 15, %v274_v23  ;;  %v354_v36 = vand.u32 15, %v290_v24 }
 0x266   :  { %1597 = vmatpush.msk.msrb.mxu0 %vm218_vm11, %v1693_v38  ;;  %vm219_vm10 = vmand %vm180_vm3, %vm203_vm4  ;;  %vm2191_vm11 = vcmp.eq.s32.totalorder %v357_v8, %v1814_v15  ;;  %v373_v39 = vand.u32 15, %v309_v25  ;;  %v337_v42 = vand.u32 15, %v273_v31  ;;  %v372_v4 = vand.u32 15, %v308_v48 }
 0x267   :  { %1605 = vmatpush.msk.msrb.mxu1 %vm219_vm10, %v1693_v38  ;;  %vm220_vm0 = vmand %vm181_vm7, %vm204_vm9  ;;  %1618 = vmatpush.msk.msra.mxu2 %vm392_vm15, %v1693_v38  ;;  %vm391_vm7 = vcmp.eq.s32.totalorder %v327_v54, %v1814_v15  ;;  %vm2186_vm9 = vcmp.eq.s32.totalorder %v341_v26, %v1814_v15  ;;  %vm390_vm10 = vcmp.eq.s32.totalorder %v326_v58, %v1814_v15  ;;  %v272_v54 = vadd.s32 184, %v1809_v13 }
 0x268   :  { %1613 = vmatpush.msk.msra.mxu3 %vm220_vm0, %v1693_v38  ;;  %1634 = vmatpush.msk.msra.mxu0 %vm408_vm1, %v1693_v38  ;;  %vm2598_vm8 = vmmov %vm2597_vm14  ;;  %vm440_vm0 = vcmp.eq.s32.totalorder %v376_v27, %v1814_v15  ;;  %vm2199_vm15 = vcmp.eq.s32.totalorder %v340_v2, %v1814_v15  ;;  %vm2211_vm1 = vcmp.eq.s32.totalorder %v356_v7, %v1814_v15  ;;  %v307_v8 = vadd.s32 464, %v1809_v13 }
 0x269   :  { %1650 = vmatpush.msk.msra.mxu1 %vm424_vm12, %v1693_v38  ;;  %vm2599_vm3 = vmmov %vm2598_vm8  ;;  %1619 = vmatpush.msk.msra.mxu2 %vm391_vm7, %v1693_v38  ;;  %vm2216_vm12 = vcmp.eq.s32.totalorder %v375_v11, %v1814_v15  ;;  %vm2261_vm7 = vcmp.eq.s32.totalorder %v355_v22, %v1814_v15  ;;  %v336_v58 = vand.u32 15, %v272_v54  ;;  %v271_v60 = vadd.s32 176, %v1809_v13 }
 0x26a   :  { %vm2600_vm4 = vmmov %vm2599_vm3  ;;  %1635 = vmatpush.msk.msra.mxu0 %vm2144_vm5, %v1693_v38  ;;  %1666 = vmatpush.msk.msrb.mxu3 %vm440_vm0, %v1693_v38  ;;  %vm389_vm5 = vcmp.eq.s32.totalorder %v325_v21, %v1814_v15  ;;  %vm2305_vm0 = vcmp.eq.s32.totalorder %v337_v42, %v1814_v15  ;;  %v371_v27 = vand.u32 15, %v307_v8  ;;  %v287_v28 = vadd.s32 304, %v1809_v13 }
 0x26b   :  { %1651 = vmatpush.msk.msra.mxu1 %vm2152_vm2, %v1693_v38  ;;  %1620 = vmatpush.msk.msra.mxu2 %vm390_vm10, %v1693_v38  ;;  %vm2240_vm2 = vcmp.eq.s32.totalorder %v339_v62, %v1814_v15  ;;  %vm2283_vm10 = vcmp.eq.s32.totalorder %v373_v39, %v1814_v15  ;;  %v335_v7 = vand.u32 15, %v271_v60  ;;  %v370_v21 = vand.u32 15, %v306_v9  ;;  %v947_v62 = vpop.f32.mrf.mxu2 }
 0x26c   :  { %1636 = vmatpush.msk.msra.mxu0 %vm2157_vm13, %v1693_v38  ;;  %1667 = vmatpush.msk.msrb.mxu3 %vm2216_vm12, %v1693_v38  ;;  %vm2613_vm13 = vmmov %vm2599_vm3  ;;  %vm386_vm12 = vcmp.eq.s32.totalorder %v322_v10, %v1814_v15  ;;  %v351_v16 = vand.u32 15, %v287_v28  ;;  %v286_v22 = vadd.s32 296, %v1809_v13  ;;  %v305_v23 = vadd.s32 448, %v1809_v13  ;;  %v2448_v10 = vpop.f32.mrf.mxu0 }
 0x26d   :  { %1652 = vmatpush.msk.msra.mxu1 %vm2162_vm6, %v1693_v38  ;;  %1621 = vmatpush.msk.msra.mxu2 %vm389_vm5, %v1693_v38  ;;  %vm2614_vm6 = vmmov %vm2599_vm3  ;;  %v320_v24 = vand.u32 15, %v1879_v47  ;;  %v284_v41 = vadd.s32 280, %v1809_v13  ;;  %v283_v54 = vadd.s32 272, %v1809_v13  ;;  %v366_v8 = vand.u32 15, %v302_v52 }
 0x26e   :  { %1637 = vmatpush.msk.msra.mxu0 %vm2186_vm9, %v1693_v38  ;;  %vm2266_vm9 = vcmp.eq.s32.totalorder %v338_v35, %v1814_v15  ;;  %v350_v47 = vand.u32 15, %v286_v22  ;;  %v369_v31 = vand.u32 15, %v305_v23  ;;  %v304_v35 = vadd.s32 440, %v1809_v13 }
 0x26f   :  { %1653 = vmatpush.msk.msra.mxu1 %vm2191_vm11, %v1693_v38  ;;  %vm2271_vm11 = vcmp.eq.s32.totalorder %v354_v36, %v1814_v15  ;;  %v319_v36 = vand.u32 15, %v1885_v50  ;;  %v348_v48 = vand.u32 15, %v284_v41  ;;  %v347_v6 = vand.u32 15, %v283_v54  ;;  %v79_v41 = vld [vmem:[%s2583_s6 + $0x98] sm:$0xff] }
 0x270   :  { %1638 = vmatpush.msk.msra.mxu0 %vm2199_vm15, %v1693_v38  ;;  %vm387_vm15 = vcmp.eq.s32.totalorder %v323_v53, %v1814_v15  ;;  %v368_v42 = vand.u32 15, %v304_v35  ;;  %v267_v53 = vadd.s32 144, %v1809_v13  ;;  %v282_v60 = vadd.s32 264, %v1809_v13  ;;  %v78_v35 = vld [vmem:[%s2583_s6 + $0x90] sm:$0xff]  ;;  %v46_v54 = vld [vmem:[%s2581_s4 + $0x38] sm:$0xff] }
 0x271   :  { %1654 = vmatpush.msk.msra.mxu1 %vm2211_vm1, %v1693_v38  ;;  %vm436_vm1 = vcmp.eq.s32.totalorder %v372_v4, %v1814_v15  ;;  %v265_v9 = vadd.s32 128, %v1809_v13  ;;  %v364_v12 = vand.u32 15, %v300_v61  ;;  %v298_v22 = vadd.s32 392, %v1809_v13 }
 0x272   :  { %1639 = vmatpush.msk.msra.mxu0 %vm2240_vm2, %v1693_v38  ;;  %vm2332_vm2 = vcmp.eq.s32.totalorder %v336_v58, %v1814_v15  ;;  %v331_v4 = vand.u32 15, %v267_v53  ;;  %v266_v58 = vadd.s32 136, %v1809_v13  ;;  %v297_v25 = vadd.s32 384, %v1809_v13  ;;  %v47_v53 = vld [vmem:[%s2581_s4 + $0x40] sm:$0xff] }
 0x273   :  { %1655 = vmatpush.msk.msra.mxu1 %vm2261_vm7, %v1693_v38  ;;  %vm2355_vm7 = vcmp.eq.s32.totalorder %v335_v7, %v1814_v15  ;;  %v346_v7 = vand.u32 15, %v282_v60  ;;  %v362_v23 = vand.u32 15, %v298_v22  ;;  %v45_v60 = vld [vmem:[%s2581_s4 + $0x30] sm:$0xff] }
 0x274   :  { %1640 = vmatpush.msk.msra.mxu0 %vm2266_vm9, %v1693_v38  ;;  %vm385_vm9 = vcmp.eq.s32.totalorder %v321_v63, %v1814_v15  ;;  %v330_v2 = vand.u32 15, %v266_v58  ;;  %v329_v63 = vand.u32 15, %v265_v9  ;;  %v361_v19 = vand.u32 15, %v297_v25 }
 0x275   :  { %1656 = vmatpush.msk.msra.mxu1 %vm2271_vm11, %v1693_v38  ;;  %vm2369_vm11 = vcmp.eq.s32.totalorder %v351_v16, %v1814_v15  ;;  %v315_v16 = vand.u32 15, %v1926_v17 }
 0x276   :  { %1641 = vmatpush.msk.msra.mxu0 %vm2305_vm0, %v1693_v38  ;;  %vm384_vm0 = vcmp.eq.s32.totalorder %v320_v24, %v1814_v15  ;;  %v2479_v24 = vpop.f32.mrf.mxu1 }
 0x278   :  { %1642 = vmatpush.msk.msra.mxu0 %vm2332_vm2, %v1693_v38  ;;  %vm2649_vm2 = vmmov %vm2599_vm3 }
 0x27a   :  { %1643 = vmatpush.msk.msra.mxu0 %vm2355_vm7, %v1693_v38  ;;  %vm382_vm7 = vcmp.eq.s32.totalorder %v318_v49, %v1814_v15 }
 0x2c4   :  { %v1034_v51 = vpop.f32.mrf.mxu3 }
 0x2c5   :  { %1590 = vmatmul.msk.f32.vlgmr.msrb.gmra.mxu2 %vm2597_vm14, %v1034_v51  ;;  %1598 = vmatmul.msk.f32.vlgmr.msrb.gmra.mxu0 %vm2598_vm8, %v1034_v51  ;;  %vm2248_vm14 = vcmp.eq.s32.totalorder %v374_v30, %v1814_v15  ;;  %vm2253_vm8 = vcmp.eq.s32.totalorder %v324_v29, %v1814_v15  ;;  %v334_v30 = vand.u32 15, %v270_v3  ;;  %v269_v29 = vadd.s32 160, %v1809_v13 }
 0x2c6   :  { %1606 = vmatmul.msk.f32.vlgmr.msrb.gmra.mxu1 %vm2599_vm3, %v1034_v51  ;;  %1614 = vmatmul.msk.f32.vlgmr.msra.gmra.mxu3 %vm2600_vm4, %v1034_v51  ;;  %vm2619_vm4 = vmmov %vm2599_vm3  ;;  %v353_v51 = vand.u32 15, %v289_v43  ;;  %v303_v43 = vadd.s32 432, %v1809_v13 }
 0x2c7   :  { %1668 = vmatpush.msk.msrb.mxu3 %vm2248_vm14, %v1693_v38  ;;  %1622 = vmatpush.msk.msra.mxu2 %vm2253_vm8, %v1693_v38  ;;  %vm2637_vm14 = vmmov %vm2599_vm3  ;;  %vm2347_vm8 = vcmp.eq.s32.totalorder %v371_v27, %v1814_v15  ;;  %v333_v33 = vand.u32 15, %v269_v29  ;;  %v317_v27 = vand.u32 15, %v1899_v56  ;;  %v316_v56 = vand.u32 15, %v1906_v59  ;;  %v979_v59 = vpop.f32.mrf.mxu0  ;;  %v950_v29 = vpop.f32.mrf.mxu2 }
 0x2c8   :  { %vm2324_vm5 = vcmp.eq.s32.totalorder %v353_v51, %v1814_v15  ;;  %v367_v51 = vand.u32 15, %v303_v43 }
 0x2c9   :  { %1669 = vmatpush.msk.msrb.mxu3 %vm2283_vm10, %v1693_v38  ;;  %1623 = vmatpush.msk.msra.mxu2 %vm387_vm15, %v1693_v38  ;;  %vm434_vm10 = vcmp.eq.s32.totalorder %v370_v21, %v1814_v15  ;;  %vm433_vm15 = vcmp.eq.s32.totalorder %v369_v31, %v1814_v15  ;;  %v299_v21 = vadd.s32 400, %v1809_v13  ;;  %v1011_v31 = vpop.f32.mrf.mxu1 }
 0x2ca   :  { %1657 = vmatpush.msk.msra.mxu1 %vm2324_vm5, %v1693_v38  ;;  %vm2408_vm5 = vcmp.eq.s32.totalorder %v350_v47, %v1814_v15 }
 0x2cb   :  { %1670 = vmatpush.msk.msrb.mxu3 %vm436_vm1, %v1693_v38  ;;  %1624 = vmatpush.msk.msra.mxu2 %vm386_vm12, %v1693_v38  ;;  %vm2401_vm1 = vcmp.eq.s32.totalorder %v334_v30, %v1814_v15  ;;  %vm383_vm12 = vcmp.eq.s32.totalorder %v319_v36, %v1814_v15  ;;  %v363_v17 = vand.u32 15, %v299_v21  ;;  %v313_v30 = vand.u32 15, %v1809_v13 }
 0x2cc   :  { %v1037_v32 = vpop.f32.mrf.mxu3  ;;  %1644 = vmatpush.msk.msra.mxu0 %vm2401_vm1, %v1693_v38  ;;  %vm430_vm1 = vcmp.eq.s32.totalorder %v366_v8, %v1814_v15 }
 0x2cd   :  { %1591 = vmatmul.msk.f32.gmra.mxu2 %vm2613_vm13, %v1037_v32  ;;  %1599 = vmatmul.msk.f32.gmra.mxu0 %vm2614_vm6, %v1037_v32  ;;  %vm2337_vm13 = vcmp.eq.s32.totalorder %v352_v40, %v1814_v15  ;;  %vm2636_vm6 = vmmov %vm2599_vm3  ;;  %v301_v40 = vadd.s32 416, %v1809_v13 }
 0x2ce   :  { %1607 = vmatmul.msk.f32.gmra.mxu1 %vm2599_vm3, %v1037_v32  ;;  %1615 = vmatmul.msk.f32.gmra.mxu3 %vm2619_vm4, %v1037_v32  ;;  %vm2640_vm4 = vmmov %vm2599_vm3  ;;  %v285_v32 = vadd.s32 288, %v1809_v13 }
 0x2cf   :  { %1671 = vmatpush.msk.msrb.mxu3 %vm2347_vm8, %v1693_v38  ;;  %1625 = vmatpush.msk.msra.mxu2 %vm385_vm9, %v1693_v38  ;;  %vm2652_vm8 = vmmov %vm2649_vm2  ;;  %vm431_vm9 = vcmp.eq.s32.totalorder %v367_v51, %v1814_v15  ;;  %v365_v28 = vand.u32 15, %v301_v40  ;;  %v982_v47 = vpop.f32.mrf.mxu0  ;;  %v48_v51 = vld [vmem:[%s2581_s4 + $0x48] sm:$0xff] }
 0x2d0   :  { %1658 = vmatpush.msk.msra.mxu1 %vm2337_vm13, %v1693_v38  ;;  %v349_v39 = vand.u32 15, %v285_v32  ;;  %vm2650_vm13 = vmmov %vm2649_vm2  ;;  %v953_v32 = vpop.f32.mrf.mxu2 }
 0x2d1   :  { %1672 = vmatpush.msk.msrb.mxu3 %vm434_vm10, %v1693_v38  ;;  %1626 = vmatpush.msk.msra.mxu2 %vm384_vm0, %v1693_v38  ;;  %vm412_vm10 = vcmp.eq.s32.totalorder %v348_v48, %v1814_v15  ;;  %vm395_vm0 = vcmp.eq.s32.totalorder %v331_v4, %v1814_v15  ;;  %v2504_v36 = vpop.f32.mrf.mxu1  ;;  %v888_v48 = vperm.slane %v79_v41, 0 }
 0x2d2   :  { %1659 = vmatpush.msk.msra.mxu1 %vm2369_vm11, %v1693_v38  ;;  %vm396_vm11 = vcmp.eq.s32.totalorder %v332_v46, %v1814_v15 }
 0x2d3   :  { %1673 = vmatpush.msk.msrb.mxu3 %vm433_vm15, %v1693_v38  ;;  %1627 = vmatpush.msk.msra.mxu2 %vm383_vm12, %v1693_v38  ;;  %vm411_vm15 = vcmp.eq.s32.totalorder %v347_v6, %v1814_v15  ;;  %vm381_vm12 = vcmp.eq.s32.totalorder %v317_v27, %v1814_v15  ;;  %v1006_v4 = vadd.f32 %v2450_v37, %v888_v48 }
 0x2d4   :  { %v1040_v11 = vpop.f32.mrf.mxu3  ;;  %1660 = vmatpush.msk.msra.mxu1 %vm2408_vm5, %v1693_v38  ;;  %vm394_vm5 = vcmp.eq.s32.totalorder %v330_v2, %v1814_v15  ;;  %v1009_v37 = vadd.f32 %v2479_v24, %v888_v48 }
 0x2d5   :  { %1592 = vmatmul.msk.f32.gmra.mxu2 %vm2636_vm6, %v1040_v11  ;;  %1600 = vmatmul.msk.f32.gmra.mxu0 %vm2637_vm14, %v1040_v11  ;;  %vm432_vm6 = vcmp.eq.s32.totalorder %v368_v42, %v1814_v15  ;;  %vm2651_vm14 = vmmov %vm2649_vm2 }
 0x2d6   :  { %1608 = vmatmul.msk.f32.gmra.mxu1 %vm2599_vm3, %v1040_v11  ;;  %1616 = vmatmul.msk.f32.gmra.mxu3 %vm2640_vm4, %v1040_v11  ;;  %vm397_vm3 = vcmp.eq.s32.totalorder %v333_v33, %v1814_v15  ;;  %vm413_vm4 = vcmp.eq.s32.totalorder %v349_v39, %v1814_v15  ;;  %v281_v11 = vadd.s32 256, %v1809_v13  ;;  %v77_v13 = vld [vmem:[%s2583_s6 + $0x88] sm:$0xff]  ;;  %v887_v39 = vperm.slane %v78_v35, 0 }
 0x2d7   :  { %1674 = vmatpush.msk.msrb.mxu3 %vm432_vm6, %v1693_v38  ;;  %1628 = vmatpush.msk.msra.mxu2 %vm382_vm7, %v1693_v38  ;;  %vm380_vm6 = vcmp.eq.s32.totalorder %v316_v56, %v1814_v15  ;;  %vm427_vm7 = vcmp.eq.s32.totalorder %v363_v17, %v1814_v15  ;;  %v2499_v33 = vpop.f32.mrf.mxu0 }
 0x2d8   :  { %1645 = vmatpush.msk.msra.mxu0 %vm397_vm3, %v1693_v38  ;;  %1661 = vmatpush.msk.msra.mxu1 %vm413_vm4, %v1693_v38  ;;  %v345_v3 = vand.u32 15, %v281_v11  ;;  %vm428_vm3 = vcmp.eq.s32.totalorder %v364_v12, %v1814_v15  ;;  %vm379_vm4 = vcmp.eq.s32.totalorder %v315_v16, %v1814_v15  ;;  %v956_v34 = vpop.f32.mrf.mxu2  ;;  %v977_v42 = vadd.f32 %v2448_v10, %v887_v39 }
 0x2d9   :  { %1675 = vmatpush.msk.msrb.mxu3 %vm431_vm9, %v1693_v38  ;;  %1629 = vmatpush.msk.msra.mxu2 %vm381_vm12, %v1693_v38  ;;  %vm378_vm9 = vcmp.eq.s32.totalorder %v314_v44, %v1814_v15  ;;  %v980_v40 = vadd.f32 %v979_v59, %v887_v39  ;;  %v986_v25 = vadd.f32 %v2499_v33, %v887_v39 }
 0x2da   :  { %1646 = vmatpush.msk.msra.mxu0 %vm396_vm11, %v1693_v38  ;;  %1662 = vmatpush.msk.msra.mxu1 %vm412_vm10, %v1693_v38  ;;  %vm426_vm11 = vcmp.eq.s32.totalorder %v362_v23, %v1814_v15  ;;  %vm377_vm10 = vcmp.eq.s32.totalorder %v313_v30, %v1814_v15 }
 0x2db   :  { %1676 = vmatpush.msk.msrb.mxu3 %vm430_vm1, %v1693_v38  ;;  %1630 = vmatpush.msk.msra.mxu2 %vm380_vm6, %v1693_v38  ;;  %vm1413_vm6 = vcmask 254976  }
 0x2dc   :  { %v1043_v26 = vpop.f32.mrf.mxu3  ;;  %1647 = vmatpush.msk.msra.mxu0 %vm395_vm0, %v1693_v38  ;;  %1663 = vmatpush.msk.msra.mxu1 %vm411_vm15, %v1693_v38  ;;  %vm425_vm0 = vcmp.eq.s32.totalorder %v361_v19, %v1814_v15  ;;  %vm2653_vm15 = vcmask 261120  }
 0x2dd   :  { %1593 = vmatmul.msk.f32.gmra.mxu2 %vm2649_vm2, %v1043_v26  ;;  %1601 = vmatmul.msk.f32.gmra.mxu0 %vm2650_vm13, %v1043_v26  ;;  %vm410_vm2 = vcmp.eq.s32.totalorder %v346_v7, %v1814_v15  ;;  %vm429_vm13 = vcmp.eq.s32.totalorder %v365_v28, %v1814_v15  ;;  %vm2654_vm1 = vmmov %vm2653_vm15 }
 0x2de   :  { %1609 = vmatmul.msk.f32.gmra.mxu1 %vm2651_vm14, %v1043_v26  ;;  %1617 = vmatmul.msk.f32.gmra.mxu3 %vm2652_vm8, %v1043_v26  ;;  %vm393_vm14 = vcmp.eq.s32.totalorder %v329_v63, %v1814_v15  ;;  %vm409_vm8 = vcmp.eq.s32.totalorder %v345_v3, %v1814_v15  ;;  %v886_v15 = vperm.slane %v77_v13, 0  ;;  %v983_v63 = vadd.f32 %v982_v47, %v887_v39  ;;  %vm2655_vm12 = vmmov %vm2654_vm1 }
 0x2df   :  { %1648 = vmatpush.msk.msra.mxu0 %vm394_vm5, %v1693_v38  ;;  %1664 = vmatpush.msk.msra.mxu1 %vm410_vm2, %v1693_v38  ;;  %vm2656_vm5 = vmmov %vm2654_vm1  ;;  %vm2657_vm2 = vcmask 130048  }
 0x2e0   :  { %1677 = vmatpush.msk.msrb.mxu3 %vm429_vm13, %v1693_v38  ;;  %1631 = vmatpush.msk.msra.mxu2 %vm379_vm4, %v1693_v38  ;;  %v948_v50 = vadd.f32 %v947_v62, %v886_v15  ;;  %v951_v8 = vadd.f32 %v950_v29, %v886_v15  ;;  %v954_v61 = vadd.f32 %v953_v32, %v886_v15  ;;  %vm2658_vm13 = vmmov %vm2657_vm2 }
 0x2e1   :  { %1649 = vmatpush.msk.msra.mxu0 %vm393_vm14, %v1693_v38  ;;  %1665 = vmatpush.msk.msra.mxu1 %vm409_vm8, %v1693_v38  ;;  %v957_v44 = vadd.f32 %v956_v34, %v886_v15  ;;  %vm1419_vm14 = vcmask 1024  }
 0x2e2   :  { %1678 = vmatpush.msk.msrb.mxu3 %vm428_vm3, %v1693_v38  ;;  %1632 = vmatpush.msk.msra.mxu2 %vm378_vm9, %v1693_v38 }
 0x2e4   :  { %1679 = vmatpush.msk.msrb.mxu3 %vm427_vm7, %v1693_v38  ;;  %1633 = vmatpush.msk.msra.mxu2 %vm377_vm10, %v1693_v38 }
 0x2e6   :  { %1680 = vmatpush.msk.msrb.mxu3 %vm426_vm11, %v1693_v38  ;;  %1324 = vmatpush.msrb.mxu2 %v48_v51 }
 0x2e8   :  { %1681 = vmatpush.msk.msrb.mxu3 %vm425_vm0, %v1693_v38  ;;  %v76_v38 = vld [vmem:[%s2583_s6 + $0x80] sm:$0xff]  ;;  %1325 = vmatpush.msrb.mxu2 %v47_v53 }
 0x2e9   :  { %v2513_v26 = vperm.slane %v76_v38, 0 }
 0x2ea   :  { %1326 = vmatpush.msrb.mxu2 %v46_v54 }
 0x2eb   :  { %v919_v52 = vadd.f32 %v2110_v5, %v2513_v26  ;;  %v922_v5 = vadd.f32 %v2124_v14, %v2513_v26  ;;  %v925_v59 = vadd.f32 %v2128_v18, %v2513_v26  ;;  %v1012_v14 = vadd.f32 %v1011_v31, %v888_v48 }
 0x2ec   :  { %1327 = vmatpush.msrb.mxu2 %v45_v60  ;;  %v928_v13 = vadd.f32 %v2130_v20, %v2513_v26  ;;  %v1015_v18 = vadd.f32 %v2504_v36, %v888_v48 }
 0x342   :  { %v1104_v43 = vpop.f32.mrf.mxu0 }
 0x343   :  { %v1175_v45 = vmul.f32 %v1104_v43, %v948_v50  ;;  %v1133_v46 = vpop.f32.mrf.mxu1 }
 0x344   :  { %v1176_v49 = vmul.f32 %v1133_v46, %v977_v42 }
 0x345   :  { %1235 = vmatmul.f32.vlgmr.msra.gmra.mxu0 %v1175_v45 }
 0x346   :  { %1264 = vmatmul.f32.vlgmr.msra.gmra.mxu1 %v1176_v49 }
 0x348   :  { %v1075_v6 = vpop.f32.mrf.mxu2 }
 0x349   :  { %v1174_v10 = vmul.f32 %v1075_v6, %v919_v52  ;;  %v1162_v58 = vpop.f32.mrf.mxu3 }
 0x34a   :  { %v1177_v27 = vmul.f32 %v1162_v58, %v1006_v4  ;;  %v1107_v2 = vpop.f32.mrf.mxu0 }
 0x34b   :  { %v1179_v7 = vmul.f32 %v1107_v2, %v951_v8  ;;  %v1136_v28 = vpop.f32.mrf.mxu1  ;;  %1206 = vmatmul.f32.vlgmr.msra.gmra.mxu2 %v1174_v10  ;;  %v51_v2 = vld [vmem:[%s2581_s4 + $0x60] sm:$0xff] }
 0x34c   :  { %v1180_v9 = vmul.f32 %v1136_v28, %v980_v40  ;;  %1293 = vmatmul.f32.vlgmr.msrb.gmra.mxu3 %v1177_v27  ;;  %v1690_v40 = vld [vmem:[%s2584_s2] sm:$0xff]  ;;  %v1691_v27 = vld [vmem:[%s2584_s2 + $0x8] sm:$0xff]  ;;  %1404 = vmatpush.msrb.mxu1 %v51_v2 }
 0x34d   :  { %1238 = vmatmul.f32.gmra.mxu0 %v1179_v7  ;;  %v50_v7 = vld [vmem:[%s2581_s4 + $0x58] sm:$0xff] }
 0x34e   :  { %1267 = vmatmul.f32.gmra.mxu1 %v1180_v9 }
 0x34f   :  { %1405 = vmatpush.msrb.mxu1 %v50_v7 }
 0x350   :  { %v1078_v11 = vpop.f32.mrf.mxu2 }
 0x351   :  { %v1178_v62 = vmul.f32 %v1078_v11, %v922_v5  ;;  %v1165_v56 = vpop.f32.mrf.mxu3  ;;  %v49_v5 = vld [vmem:[%s2581_s4 + $0x50] sm:$0xff] }
 0x352   :  { %v1181_v3 = vmul.f32 %v1165_v56, %v1009_v37  ;;  %v1110_v12 = vpop.f32.mrf.mxu0  ;;  %v1358_v11 = vperm.slane %v49_v5, 0 }
 0x353   :  { %v1183_v16 = vmul.f32 %v1110_v12, %v954_v61  ;;  %v1139_v21 = vpop.f32.mrf.mxu1  ;;  %1209 = vmatmul.f32.gmra.mxu2 %v1178_v62 }
 0x354   :  { %v1184_v22 = vmul.f32 %v1139_v21, %v983_v63  ;;  %1296 = vmatmul.f32.gmra.mxu3 %v1181_v3  ;;  %v38_v21 = vld [vmem:[%s2585_s3] sm:$0x3] }
 0x355   :  { %1241 = vmatmul.f32.gmra.mxu0 %v1183_v16 }
 0x356   :  { %1270 = vmatmul.f32.gmra.mxu1 %v1184_v22 }
 0x358   :  { %v1081_v17 = vpop.f32.mrf.mxu2 }
 0x359   :  { %v1182_v23 = vmul.f32 %v1081_v17, %v925_v59  ;;  %v1168_v24 = vpop.f32.mrf.mxu3  ;;  %v52_v59 = vld [vmem:[%s2581_s4 + $0x68] sm:$0xff]  ;;  %v53_v17 = vld [vmem:[%s2581_s4 + $0x70] sm:$0xff] }
 0x35a   :  { %v1185_v30 = vmul.f32 %v1168_v24, %v1012_v14  ;;  %v1113_v19 = vpop.f32.mrf.mxu0  ;;  %v1386_v14 = vperm.slane %v52_v59, 0  ;;  %v1411_v24 = vperm.slane %v53_v17, 0 }
 0x35b   :  { %v1187_v29 = vmul.f32 %v1113_v19, %v957_v44  ;;  %v1142_v47 = vpop.f32.mrf.mxu1  ;;  %1212 = vmatmul.f32.gmra.mxu2 %v1182_v23 }
 0x35c   :  { %v1188_v32 = vmul.f32 %v1142_v47, %v986_v25  ;;  %1299 = vmatmul.f32.gmra.mxu3 %v1185_v30 }
 0x35d   :  { %1244 = vmatmul.f32.gmra.mxu0 %v1187_v29  ;;  %v54_v29 = vld [vmem:[%s2581_s4 + $0x78] sm:$0xff] }
 0x35e   :  { %1273 = vmatmul.f32.gmra.mxu1 %v1188_v32  ;;  %v1417_v47 = vperm.slane %v54_v29, 0 }
 0x360   :  { %v1084_v31 = vpop.f32.mrf.mxu2 }
 0x361   :  { %v1186_v35 = vmul.f32 %v1084_v31, %v928_v13  ;;  %v1171_v15 = vpop.f32.mrf.mxu3 }
 0x362   :  { %v1189_v38 = vmul.f32 %v1171_v15, %v1015_v18 }
 0x363   :  { %1215 = vmatmul.f32.gmra.mxu2 %v1186_v35 }
 0x364   :  { %1302 = vmatmul.f32.gmra.mxu3 %v1189_v38 }
 0x36b   :  { %1682 = vmatmul.msk.f32.vlgmr.msrb.gmra.mxu2 %vm2653_vm15, %v846_v0 }
 0x373   :  { %1683 = vmatmul.msk.f32.gmra.mxu2 %vm2654_vm1, %v847_v1 }
 0x3c2   :  { %v1236_v33 = vpop.f32.mrf.mxu0 }
 0x3c3   :  { %v1265_v39 = vpop.f32.mrf.mxu1 }
 0x3ca   :  { %v1239_v41 = vpop.f32.mrf.mxu0 }
 0x3cb   :  { %v1268_v36 = vpop.f32.mrf.mxu1 }
 0x3ce   :  { %v1207_v34 = vpop.f32.mrf.mxu2 }
 0x3cf   :  { %v1294_v20 = vpop.f32.mrf.mxu3  ;;  %v1237_v53 = vadd.f32 %v1236_v33, %v1207_v34 }
 0x3d1   :  { %v1266_v8 = vadd.f32 %v1265_v39, %v1237_v53 }
 0x3d2   :  { %v1242_v43 = vpop.f32.mrf.mxu0 }
 0x3d3   :  { %v1271_v26 = vpop.f32.mrf.mxu1  ;;  %v1295_v60 = vadd.f32 %v1294_v20, %v1266_v8 }
 0x3d6   :  { %v1210_v50 = vpop.f32.mrf.mxu2 }
 0x3d7   :  { %v1297_v42 = vpop.f32.mrf.mxu3  ;;  %v1240_v0 = vadd.f32 %v1239_v41, %v1210_v50 }
 0x3d9   :  { %v1269_v4 = vadd.f32 %v1268_v36, %v1240_v0 }
 0x3da   :  { %v1245_v55 = vpop.f32.mrf.mxu0 }
 0x3db   :  { %v1274_v57 = vpop.f32.mrf.mxu1  ;;  %v1298_v58 = vadd.f32 %v1297_v42, %v1269_v4 }
 0x3de   :  { %v1213_v45 = vpop.f32.mrf.mxu2 }
 0x3df   :  { %v1300_v46 = vpop.f32.mrf.mxu3  ;;  %v1243_v48 = vadd.f32 %v1242_v43, %v1213_v45 }
 0x3e1   :  { %v1272_v1 = vadd.f32 %v1271_v26, %v1243_v48 }
 0x3e3   :  { %v1301_v10 = vadd.f32 %v1300_v46, %v1272_v1 }
 0x3e6   :  { %v1216_v49 = vpop.f32.mrf.mxu2 }
 0x3e7   :  { %v1246_v51 = vadd.f32 %v1245_v55, %v1216_v49  ;;  %v1303_v52 = vpop.f32.mrf.mxu3 }
 0x3e9   :  { %v1275_v54 = vadd.f32 %v1274_v57, %v1246_v51 }
 0x3eb   :  { %v1304_v6 = vadd.f32 %v1303_v52, %v1275_v54 }
 0x3ed   :  { %1347 = vmatpush.msrb.mxu0 %v1304_v6 }
 0x3ee   :  { %v1329_v28 = vpop.f32.mrf.mxu2 }
 0x3ef   :  { %1348 = vmatpush.msrb.mxu0 %v1301_v10 }
 0x3f1   :  { %1349 = vmatpush.msrb.mxu0 %v1298_v58 }
 0x3f3   :  { %1350 = vmatpush.msrb.mxu0 %v1295_v60 }
 0x3f4   :  { %1684 = vmatmul.msk.f32.vlgmr.msrb.gmra.mxu0 %vm2655_vm12, %v1690_v40 }
 0x3f6   :  { %v1332_v61 = vpop.f32.mrf.mxu2 }
 0x3fc   :  { %1685 = vmatmul.msk.f32.gmra.mxu0 %vm2656_vm5, %v1691_v27 }
 0x471   :  { %v1352_v9 = vpop.f32.mrf.mxu0 }
 0x472   :  { %v1353_v37 = vadd.f32 %v1352_v9, %v1329_v28 }
 0x474   :  { %v1359_v63 = vadd.f32 %v1358_v11, %v1353_v37 }
 0x476   :  { %v1361_v16 = vmax.f32 %v1359_v63, 0.0 }
 0x479   :  { %v1355_v62 = vpop.f32.mrf.mxu0 }
 0x47a   :  { %v1356_v56 = vadd.f32 %v1355_v62, %v1332_v61 }
 0x47c   :  { %v1360_v3 = vadd.f32 %v1358_v11, %v1356_v56 }
 0x47e   :  { %v1362_v12 = vmax.f32 %v1360_v3, 0.0 }
 0x480   :  { %1380 = vmatpush.msra.mxu2 %v1362_v12 }
 0x482   :  { %1381 = vmatpush.msra.mxu2 %v1361_v16 }
 0x483   :  { %1686 = vmatmul.msk.f32.vlgmr.msra.gmra.mxu2 %vm2657_vm2, %v38_v21 }
 0x506   :  { %v1383_v22 = vpop.f32.mrf.mxu2 }
 0x507   :  { %1687 = vmatmul.msk.f32.vlgmr.msrb.gmra.mxu1 %vm2658_vm13, %v1383_v22 }
 0x584   :  { %v1407_v44 = vpop.f32.mrf.mxu1 }
 0x585   :  { %v1408_v23 = vadd.f32 %v1407_v44, %v1386_v14 }
 0x587   :  { %v1410_v25 = vmax.f32 %v1408_v23, 0.0 }
 0x589   :  { %v1412_v30 = vmul.f32 %v1411_v24, %v1410_v25 }
 0x58b   :  { %v1414_v19 = vsel %vm1413_vm6, %v1412_v30, 0.0 }
 0x58c   :  { %1415 = vadd.xlane.f32.xlu0 %v1414_v19 }
 0x5ff   :  { %v1416_v32 = vpop.xlane.xlu0 %1415 }
 0x600   :  { %v1418_v13 = vadd.f32 %v1417_v47, %v1416_v32 }
 0x602   :  { %1420 = vst.msk [vmem:[%s2586_s7] sm:$0x3] %vm1419_vm14, %v1418_v13 }

</bundles_post_ra>
